<compile_context>
chip_gen: v7x
topology: tpu7x:2x2x1
jax: 0.10.0
libtpu: 0.0.40
codegen_flags: <defaults>
</compile_context>

<pallas_src>
import jax
import jax.numpy as jnp
import numpy as np
from jax import lax
from jax.experimental import pallas as pl
from jax.experimental.pallas import tpu as pltpu


def _round_up(x, m):
    return ((x + m - 1) // m) * m


def universal_rnn_forward(ids, params, block_b=64, block_t=64):
    """ids: int32 [B, T]. Returns float32 [B, T, out_channels]."""
    emb_table = params["embedding"]                       # (V, H) f32
    H = emb_table.shape[1]
    C = params["b_cls"].shape[0]
    B, T = ids.shape

    LANE, SUB = 128, 8
    bf16, f32 = jnp.bfloat16, jnp.float32

    Hp = _round_up(H, LANE)                               # lane-dense hidden size
    Cp = _round_up(C, LANE)                               # lane-dense classifier output

    # Batch tile: aim for >=2 grid tiles when B allows it (v7x megacore + DMA overlap).
    Bblk = max(SUB, min(block_b, _round_up(-(-B // 2), SUB)))
    Bp = _round_up(B, Bblk)
    nB = Bp // Bblk

    # Time chunk: VMEM footprint is O(Tc); hidden state carried across chunks.
    Tc = min(block_t, T)
    nT = -(-T // Tc)
    Tp = nT * Tc
    ragged_t = (Tp != T)                                  # need masking of padded steps

    def pad2(w, shape):
        return jnp.pad(w, ((0, shape[0] - w.shape[0]), (0, shape[1] - w.shape[1])))

    def pad1(v, n):
        return jnp.pad(v, (0, n - v.shape[0]))

    def gate(w, g):                                       # gate g rows of a (3H, X) tensor
        return w[g * H:(g + 1) * H]

    def prep_dir(w_ih, w_hh, b_ih, b_hh):
        # Input projection as one (Hp, 3Hp) matrix; gate blocks at lane offsets 0/Hp/2Hp.
        wih = jnp.concatenate(
            [pad2(gate(w_ih, g).T, (Hp, Hp)) for g in range(3)], axis=1).astype(bf16)
        # Hidden projection FUSED into one (Hp, 3Hp) matrix -> a single recurrent matmul
        # per step per direction on the serial critical path.
        whh = jnp.concatenate(
            [pad2(gate(w_hh, g).T, (Hp, Hp)) for g in range(3)], axis=1).astype(bf16)
        # Fold b_ih (all gates) + b_hh (r, z gates) into the precomputed gx; only the
        # n-gate b_hn stays in the loop (it must be added before the r* multiply).
        bfold = jnp.concatenate([
            pad1(b_ih[0 * H:1 * H] + b_hh[0 * H:1 * H], Hp),
            pad1(b_ih[1 * H:2 * H] + b_hh[1 * H:2 * H], Hp),
            pad1(b_ih[2 * H:3 * H], Hp),
        ])[None, :].astype(f32)                           # (1, 3Hp)
        bhn = pad1(b_hh[2 * H:3 * H], Hp)[None, :].astype(f32)   # (1, Hp)
        return wih, whh, bfold, bhn

    fwd = prep_dir(params["w_ih_f"], params["w_hh_f"], params["b_ih_f"], params["b_hh_f"])
    bwd = prep_dir(params["w_ih_b"], params["w_hh_b"], params["b_ih_b"], params["b_hh_b"])

    wcls = params["w_cls"]                                # (C, 2H): [fwd | bwd] features
    wcls_f = pad2(wcls[:, :H].T, (Hp, Cp)).astype(bf16)
    wcls_b = pad2(wcls[:, H:].T, (Hp, Cp)).astype(bf16)
    bcls = pad1(params["b_cls"], Cp)[None, :].astype(f32)

    # Embedding gather in bf16, time-major (Tp, Bp, Hp) so each chunk is a clean slab.
    # TODO(synk): fuse the gather into the kernel (scalar-prefetched ids + manual DMA or a
    # VMEM-resident table) to remove this HBM round trip on bandwidth-limited chips (v5e).
    emb_table_p = jnp.pad(emb_table, ((0, 0), (0, Hp - H))).astype(bf16)
    ids_p = jnp.pad(ids, ((0, Bp - B), (0, Tp - T)))
    emb = jnp.take(emb_table_p, ids_p.T, axis=0)          # (Tp, Bp, Hp) bf16

    def kernel(emb_f_ref, emb_b_ref,
               wih_f_ref, whh_f_ref, bfold_f_ref, bhn_f_ref,
               wih_b_ref, whh_b_ref, bfold_b_ref, bhn_b_ref,
               wcls_f_ref, wcls_b_ref, bcls_ref,
               out_f_ref, out_b_ref,
               gxf, gxb, hf, hb, hcar_f, hcar_b):
        t = pl.program_id(1)

        # Reset the carried hidden states at the start of each batch tile's chunk sweep.
        @pl.when(t == 0)
        def _():
            hcar_f[...] = jnp.zeros_like(hcar_f)
            hcar_b[...] = jnp.zeros_like(hcar_b)

        # ---- Input projections for this chunk only (f32 transient bounded to a chunk). ----
        xf = emb_f_ref[...].reshape(Tc * Bblk, Hp)
        gxf[...] = (jnp.dot(xf, wih_f_ref[...], preferred_element_type=f32)
                    + bfold_f_ref[...]).reshape(Tc, Bblk, 3 * Hp).astype(gxf.dtype)
        xb = emb_b_ref[...].reshape(Tc * Bblk, Hp)
        gxb[...] = (jnp.dot(xb, wih_b_ref[...], preferred_element_type=f32)
                    + bfold_b_ref[...]).reshape(Tc, Bblk, 3 * Hp).astype(gxb.dtype)

        # ---- Hoist loop-invariant weight / bias reads. ----
        whh_f = whh_f_ref[...]
        whh_b = whh_b_ref[...]
        bhn_f = bhn_f_ref[...]
        bhn_b = bhn_b_ref[...]

        def gru_step(gx, h_prev, whh, bhn):
            # One fused (Bblk,Hp)@(Hp,3Hp) recurrent matmul; gate slices at lane offsets
            # 0 / Hp / 2Hp (multiples of 128 -> vreg-aligned, free).
            gh = jnp.dot(h_prev.astype(bf16), whh, preferred_element_type=f32)
            r = jax.nn.sigmoid(gx[:, 0 * Hp:1 * Hp] + gh[:, 0 * Hp:1 * Hp])
            z = jax.nn.sigmoid(gx[:, 1 * Hp:2 * Hp] + gh[:, 1 * Hp:2 * Hp])
            n = jnp.tanh(gx[:, 2 * Hp:3 * Hp] + r * (gh[:, 2 * Hp:3 * Hp] + bhn))
            return (1.0 - z) * n + z * h_prev

        # ---- Fused forward + backward recurrence over this chunk (independent carries;
        #      the two directions hide each other's MXU/EUP latency). Forward walks the
        #      chunk ascending; backward walks its mirrored chunk descending. ----
        def body(i, carry):
            h_f, h_b = carry
            j = Tc - 1 - i
            h_f_new = gru_step(gxf[i], h_f, whh_f, bhn_f)
            h_b_new = gru_step(gxb[j], h_b, whh_b, bhn_b)
            if ragged_t:
                # Padded timesteps (global index >= T) must not update the carry; the
                # backward direction sees the time padding first, so this is required.
                vf = ((t * Tc + i) < T).astype(f32)
                vb = (((nT - 1 - t) * Tc + j) < T).astype(f32)
                h_f_new = vf * h_f_new + (1.0 - vf) * h_f
                h_b_new = vb * h_b_new + (1.0 - vb) * h_b
            hf[i] = h_f_new.astype(hf.dtype)
            hb[j] = h_b_new.astype(hb.dtype)
            return (h_f_new, h_b_new)

        h_f_fin, h_b_fin = lax.fori_loop(0, Tc, body, (hcar_f[...], hcar_b[...]))
        hcar_f[...] = h_f_fin
        hcar_b[...] = h_b_fin

        # ---- Per-chunk classifier on concat([h_fwd, h_bwd]) as a split matmul.
        #      Chunked stores keep peak VMEM low and overlap writeback with later chunks. ----
        of = (jnp.dot(hf[...].reshape(Tc * Bblk, Hp), wcls_f_ref[...],
                      preferred_element_type=f32) + bcls_ref[...])
        out_f_ref[...] = of.reshape(Tc, Bblk, Cp).astype(out_f_ref.dtype)
        ob = jnp.dot(hb[...].reshape(Tc * Bblk, Hp), wcls_b_ref[...],
                     preferred_element_type=f32)
        out_b_ref[...] = ob.reshape(Tc, Bblk, Cp).astype(out_b_ref.dtype)

    # ---- Explicit scoped-VMEM budget computed from the actual footprint (+headroom). ----
    def _vmem_bytes():
        emb_blk = Tc * Bblk * Hp * 2                       # bf16, two specs
        out_blk = Tc * Bblk * Cp * 4                       # f32, two specs
        weights = 2 * (2 * Hp * 3 * Hp * 2 + Hp * Cp * 2 + (3 * Hp + Hp) * 4) + Cp * 4
        scratch = (2 * Tc * Bblk * 3 * Hp * 2 + 2 * Tc * Bblk * Hp * 2
                   + 2 * Bblk * Hp * 4)
        transient = Tc * Bblk * 3 * Hp * 4 + Tc * Bblk * Cp * 4
        return 2 * (2 * emb_blk + 2 * out_blk + weights) + scratch + transient

    # Cap at 60 MiB so the limit never exceeds v7x's 64 MiB physical VMEM.
    # TODO(synk): single-buffer the constant-index weight blocks (pipeline_mode) to shave
    # a few hundred KiB more under the v7x budget.
    vmem_limit = int(min(60 * (1 << 20), max(32 * (1 << 20), int(1.6 * _vmem_bytes()))))

    w_spec = lambda shape: pl.BlockSpec(shape, lambda b, t: (0, 0))

    out_f, out_b = pl.pallas_call(
        kernel,
        out_shape=(jax.ShapeDtypeStruct((Tp, Bp, Cp), f32),
                   jax.ShapeDtypeStruct((Tp, Bp, Cp), f32)),
        grid_spec=pltpu.PrefetchScalarGridSpec(
            num_scalar_prefetch=0,
            grid=(nB, nT),
            in_specs=[
                pl.BlockSpec((Tc, Bblk, Hp), lambda b, t: (t, b, 0)),           # fwd chunk
                pl.BlockSpec((Tc, Bblk, Hp), lambda b, t: (nT - 1 - t, b, 0)),  # bwd chunk
                w_spec((Hp, 3 * Hp)), w_spec((Hp, 3 * Hp)),
                w_spec((1, 3 * Hp)), w_spec((1, Hp)),
                w_spec((Hp, 3 * Hp)), w_spec((Hp, 3 * Hp)),
                w_spec((1, 3 * Hp)), w_spec((1, Hp)),
                w_spec((Hp, Cp)), w_spec((Hp, Cp)), w_spec((1, Cp)),
            ],
            out_specs=[
                pl.BlockSpec((Tc, Bblk, Cp), lambda b, t: (t, b, 0)),
                pl.BlockSpec((Tc, Bblk, Cp), lambda b, t: (nT - 1 - t, b, 0)),
            ],
            scratch_shapes=[
                pltpu.VMEM((Tc, Bblk, 3 * Hp), bf16),   # gx forward  (r|z|n)
                pltpu.VMEM((Tc, Bblk, 3 * Hp), bf16),   # gx backward (r|z|n)
                pltpu.VMEM((Tc, Bblk, Hp), bf16),       # forward hidden states (chunk)
                pltpu.VMEM((Tc, Bblk, Hp), bf16),       # backward hidden states (chunk)
                pltpu.VMEM((Bblk, Hp), f32),            # forward carry across chunks
                pltpu.VMEM((Bblk, Hp), f32),            # backward carry across chunks
            ],
        ),
        compiler_params=pltpu.CompilerParams(
            dimension_semantics=("parallel", "arbitrary"),   # batch tiles independent
            vmem_limit_bytes=vmem_limit,
        ),
    )(emb, emb, *fwd, *bwd, wcls_f, wcls_b, bcls)

    # Slice off time / batch / class padding BEFORE the add + transpose (post-kernel HBM
    # traffic is (T, B, C) instead of (Tp, Bp, Cp)).
    out = out_f[:T, :B, :C] + out_b[:T, :B, :C]
    return jnp.transpose(out, (1, 0, 2))                  # (B, T, C)


def init_params(key, num_embeddings, out_channels, rnn_channels):
    """Deterministic synthetic parameters matching nn.Embedding / nn.GRU / nn.Linear shapes."""
    H = rnn_channels
    k = 1.0 / np.sqrt(H)
    keys = jax.random.split(key, 12)
    u = lambda kk, shape: jax.random.uniform(kk, shape, jnp.float32, -k, k)
    return {
        "embedding": jax.random.normal(keys[0], (num_embeddings, H), jnp.float32),
        # GRU weights in PyTorch layout: (3H, H) with gate order r, z, n.
        "w_ih_f": u(keys[1], (3 * H, H)), "w_hh_f": u(keys[2], (3 * H, H)),
        "b_ih_f": u(keys[3], (3 * H,)),   "b_hh_f": u(keys[4], (3 * H,)),
        "w_ih_b": u(keys[5], (3 * H, H)), "w_hh_b": u(keys[6], (3 * H, H)),
        "b_ih_b": u(keys[7], (3 * H,)),   "b_hh_b": u(keys[8], (3 * H,)),
        # Linear(2H -> C)
        "w_cls": u(keys[9], (out_channels, 2 * H)),
        "b_cls": u(keys[10], (out_channels,)),
    }


def _reference_forward(ids, params):
    """Pure-JAX f32 reference of the PyTorch forward (for numerical validation)."""
    H = params["w_hh_f"].shape[1]
    emb = jnp.take(params["embedding"], ids, axis=0)      # (B, T, H)

    def gru_dir(x_bt_h, w_ih, w_hh, b_ih, b_hh, reverse):
        def cell(h, x_t):
            gx = x_t @ w_ih.T + b_ih
            gh = h @ w_hh.T + b_hh
            r = jax.nn.sigmoid(gx[:, :H] + gh[:, :H])
            z = jax.nn.sigmoid(gx[:, H:2 * H] + gh[:, H:2 * H])
            n = jnp.tanh(gx[:, 2 * H:] + r * gh[:, 2 * H:])
            h_new = (1.0 - z) * n + z * h
            return h_new, h_new
        x_tbh = jnp.swapaxes(x_bt_h, 0, 1)                # (T, B, H)
        h0 = jnp.zeros((x_bt_h.shape[0], H), jnp.float32)
        _, hs = lax.scan(cell, h0, x_tbh, reverse=reverse)
        return jnp.swapaxes(hs, 0, 1)                     # (B, T, H)

    hf = gru_dir(emb, params["w_ih_f"], params["w_hh_f"], params["b_ih_f"], params["b_hh_f"], False)
    hb = gru_dir(emb, params["w_ih_b"], params["w_hh_b"], params["b_ih_b"], params["b_hh_b"], True)
    h = jnp.concatenate([hf, hb], axis=-1)                # (B, T, 2H)
    return h @ params["w_cls"].T + params["b_cls"]        # (B, T, C)


if __name__ == "__main__":
    B, T = 2, 8
    num_embeddings, rnn_channels, out_channels = 16, 32, 4

    key = jax.random.PRNGKey(0)
    kp, kx = jax.random.split(key)
    params = init_params(kp, num_embeddings, out_channels, rnn_channels)
    ids = jax.random.randint(kx, (B, T), 0, num_embeddings, dtype=jnp.int32)

    fwd_fn = jax.jit(universal_rnn_forward, static_argnames=("block_b", "block_t"))

    out = jax.block_until_ready(fwd_fn(ids, params, block_b=64, block_t=64))
    ref = jax.block_until_ready(_reference_forward(ids, params))
    assert out.shape == (B, T, out_channels), out.shape
    max_err = float(np.max(np.abs(np.asarray(out) - np.asarray(ref))))
    # bf16 matmul operands (f32 accumulation) -> relaxed tolerance vs. the f32 reference.
    assert np.allclose(np.asarray(out), np.asarray(ref), rtol=5e-2, atol=5e-2), max_err

    # Exercise the chunked-time / multi-batch-tile / ragged-T path at tiny cost.
    B2, T2 = 9, 7
    ids2 = jax.random.randint(jax.random.fold_in(kx, 1), (B2, T2), 0,
                              num_embeddings, dtype=jnp.int32)
    out2 = jax.block_until_ready(fwd_fn(ids2, params, block_b=8, block_t=3))
    ref2 = jax.block_until_ready(_reference_forward(ids2, params))
    assert out2.shape == (B2, T2, out_channels), out2.shape
    max_err2 = float(np.max(np.abs(np.asarray(out2) - np.asarray(ref2))))
    assert np.allclose(np.asarray(out2), np.asarray(ref2), rtol=5e-2, atol=5e-2), max_err2

    print("KERNEL_OK")
</pallas_src>

<mosaic_0001>
module attributes {stable_mosaic.version = 11 : i64} {
  func.func @kernel(%arg0: i32, %arg1: i32, %arg2: memref<8x8x128xbf16, #tpu.memory_space<vmem>>, %arg3: memref<8x8x128xbf16, #tpu.memory_space<vmem>>, %arg4: memref<128x384xbf16, #tpu.memory_space<vmem>>, %arg5: memref<128x384xbf16, #tpu.memory_space<vmem>>, %arg6: memref<1x384xf32, #tpu.memory_space<vmem>>, %arg7: memref<1x128xf32, #tpu.memory_space<vmem>>, %arg8: memref<128x384xbf16, #tpu.memory_space<vmem>>, %arg9: memref<128x384xbf16, #tpu.memory_space<vmem>>, %arg10: memref<1x384xf32, #tpu.memory_space<vmem>>, %arg11: memref<1x128xf32, #tpu.memory_space<vmem>>, %arg12: memref<128x128xbf16, #tpu.memory_space<vmem>>, %arg13: memref<128x128xbf16, #tpu.memory_space<vmem>>, %arg14: memref<1x128xf32, #tpu.memory_space<vmem>>, %arg15: memref<8x8x128xf32, #tpu.memory_space<vmem>>, %arg16: memref<8x8x128xf32, #tpu.memory_space<vmem>>, %arg17: memref<8x8x384xbf16, #tpu.memory_space<vmem>>, %arg18: memref<8x8x384xbf16, #tpu.memory_space<vmem>>, %arg19: memref<8x8x128xbf16, #tpu.memory_space<vmem>>, %arg20: memref<8x8x128xbf16, #tpu.memory_space<vmem>>, %arg21: memref<8x128xf32, #tpu.memory_space<vmem>>, %arg22: memref<8x128xf32, #tpu.memory_space<vmem>>) attributes {dimension_semantics = [#tpu.dimension_semantics<parallel>, #tpu.dimension_semantics<arbitrary>], iteration_bounds = array<i64: 1, 1>, scalar_prefetch = 0 : i64, scratch_operands = 6 : i64, tpu.core_type = #tpu.core_type<tc>, window_params = [{transform_indices = @transform_0, window_bounds = array<i64: 8, 8, 128>}, {transform_indices = @transform_1, window_bounds = array<i64: 8, 8, 128>}, {pipeline_mode = #tpu.pipeline_mode<synchronous>, transform_indices = @transform_2, window_bounds = array<i64: 128, 384>}, {pipeline_mode = #tpu.pipeline_mode<synchronous>, transform_indices = @transform_3, window_bounds = array<i64: 128, 384>}, {pipeline_mode = #tpu.pipeline_mode<synchronous>, transform_indices = @transform_4, window_bounds = array<i64: 1, 384>}, {pipeline_mode = #tpu.pipeline_mode<synchronous>, transform_indices = @transform_5, window_bounds = array<i64: 1, 128>}, {pipeline_mode = #tpu.pipeline_mode<synchronous>, transform_indices = @transform_6, window_bounds = array<i64: 128, 384>}, {pipeline_mode = #tpu.pipeline_mode<synchronous>, transform_indices = @transform_7, window_bounds = array<i64: 128, 384>}, {pipeline_mode = #tpu.pipeline_mode<synchronous>, transform_indices = @transform_8, window_bounds = array<i64: 1, 384>}, {pipeline_mode = #tpu.pipeline_mode<synchronous>, transform_indices = @transform_9, window_bounds = array<i64: 1, 128>}, {pipeline_mode = #tpu.pipeline_mode<synchronous>, transform_indices = @transform_10, window_bounds = array<i64: 128, 128>}, {pipeline_mode = #tpu.pipeline_mode<synchronous>, transform_indices = @transform_11, window_bounds = array<i64: 128, 128>}, {pipeline_mode = #tpu.pipeline_mode<synchronous>, transform_indices = @transform_12, window_bounds = array<i64: 1, 128>}, {transform_indices = @transform_13, window_bounds = array<i64: 8, 8, 128>}, {transform_indices = @transform_14, window_bounds = array<i64: 8, 8, 128>}]} {
    %c0_i32 = arith.constant 0 : i32
    %0 = arith.cmpi eq, %arg1, %c0_i32 : i32
    %1 = arith.extui %0 : i1 to i32
    %c0_i32_0 = arith.constant 0 : i32
    %2 = arith.cmpi ne, %1, %c0_i32_0 : i32
    scf.if %2 {
      %cst_59 = arith.constant 0.000000e+00 : f32
      %48 = vector.broadcast %cst_59 : f32 to vector<8x128xf32>
      %c0_60 = arith.constant 0 : index
      %c0_61 = arith.constant 0 : index
      %49 = vector.load %arg21[%c0_60, %c0_61] : memref<8x128xf32, #tpu.memory_space<vmem>>, vector<8x128xf32>
      tpu.vector_store %arg21[%c0_60, %c0_61], %48 {strides = array<i32>} : memref<8x128xf32, #tpu.memory_space<vmem>>, vector<8x128xf32>,
      %cst_62 = arith.constant 0.000000e+00 : f32
      %50 = vector.broadcast %cst_62 : f32 to vector<8x128xf32>
      %c0_63 = arith.constant 0 : index
      %c0_64 = arith.constant 0 : index
      %51 = vector.load %arg22[%c0_63, %c0_64] : memref<8x128xf32, #tpu.memory_space<vmem>>, vector<8x128xf32>
      tpu.vector_store %arg22[%c0_63, %c0_64], %50 {strides = array<i32>} : memref<8x128xf32, #tpu.memory_space<vmem>>, vector<8x128xf32>,
    } else {
    }
    %c0 = arith.constant 0 : index
    %c0_1 = arith.constant 0 : index
    %c0_2 = arith.constant 0 : index
    %3 = vector.load %arg2[%c0, %c0_1, %c0_2] : memref<8x8x128xbf16, #tpu.memory_space<vmem>>, vector<8x8x128xbf16>
    %4 = vector.shape_cast %3 : vector<8x8x128xbf16> to vector<64x128xbf16>
    %c0_3 = arith.constant 0 : index
    %c0_4 = arith.constant 0 : index
    %5 = vector.load %arg4[%c0_3, %c0_4] : memref<128x384xbf16, #tpu.memory_space<vmem>>, vector<128x384xbf16>
    %cst = arith.constant dense<0.000000e+00> : vector<64x384xf32>
    %6 = tpu.matmul %4, %5, %cst {dimension_numbers = #tpu.dot_dimension_numbers<[1], [0], [0], [1], [0, 0, 1, 1], [], []>} : vector<64x128xbf16>, vector<128x384xbf16>, vector<64x384xf32> -> vector<64x384xf32>
    %c0_5 = arith.constant 0 : index
    %c0_6 = arith.constant 0 : index
    %7 = vector.load %arg6[%c0_5, %c0_6] : memref<1x384xf32, #tpu.memory_space<vmem>>, vector<1x384xf32>
    %8 = vector.broadcast %7 : vector<1x384xf32> to vector<64x384xf32>
    %9 = arith.addf %6, %8 : vector<64x384xf32>
    %10 = vector.shape_cast %9 : vector<64x384xf32> to vector<8x8x384xf32>
    %11 = arith.truncf %10 : vector<8x8x384xf32> to vector<8x8x384xbf16>
    %c0_7 = arith.constant 0 : index
    %c0_8 = arith.constant 0 : index
    %c0_9 = arith.constant 0 : index
    %12 = vector.load %arg17[%c0_7, %c0_8, %c0_9] : memref<8x8x384xbf16, #tpu.memory_space<vmem>>, vector<8x8x384xbf16>
    tpu.vector_store %arg17[%c0_7, %c0_8, %c0_9], %11 {strides = array<i32>} : memref<8x8x384xbf16, #tpu.memory_space<vmem>>, vector<8x8x384xbf16>,
    %c0_10 = arith.constant 0 : index
    %c0_11 = arith.constant 0 : index
    %c0_12 = arith.constant 0 : index
    %13 = vector.load %arg3[%c0_10, %c0_11, %c0_12] : memref<8x8x128xbf16, #tpu.memory_space<vmem>>, vector<8x8x128xbf16>
    %14 = vector.shape_cast %13 : vector<8x8x128xbf16> to vector<64x128xbf16>
    %c0_13 = arith.constant 0 : index
    %c0_14 = arith.constant 0 : index
    %15 = vector.load %arg8[%c0_13, %c0_14] : memref<128x384xbf16, #tpu.memory_space<vmem>>, vector<128x384xbf16>
    %cst_15 = arith.constant dense<0.000000e+00> : vector<64x384xf32>
    %16 = tpu.matmul %14, %15, %cst_15 {dimension_numbers = #tpu.dot_dimension_numbers<[1], [0], [0], [1], [0, 0, 1, 1], [], []>} : vector<64x128xbf16>, vector<128x384xbf16>, vector<64x384xf32> -> vector<64x384xf32>
    %c0_16 = arith.constant 0 : index
    %c0_17 = arith.constant 0 : index
    %17 = vector.load %arg10[%c0_16, %c0_17] : memref<1x384xf32, #tpu.memory_space<vmem>>, vector<1x384xf32>
    %18 = vector.broadcast %17 : vector<1x384xf32> to vector<64x384xf32>
    %19 = arith.addf %16, %18 : vector<64x384xf32>
    %20 = vector.shape_cast %19 : vector<64x384xf32> to vector<8x8x384xf32>
    %21 = arith.truncf %20 : vector<8x8x384xf32> to vector<8x8x384xbf16>
    %c0_18 = arith.constant 0 : index
    %c0_19 = arith.constant 0 : index
    %c0_20 = arith.constant 0 : index
    %22 = vector.load %arg18[%c0_18, %c0_19, %c0_20] : memref<8x8x384xbf16, #tpu.memory_space<vmem>>, vector<8x8x384xbf16>
    tpu.vector_store %arg18[%c0_18, %c0_19, %c0_20], %21 {strides = array<i32>} : memref<8x8x384xbf16, #tpu.memory_space<vmem>>, vector<8x8x384xbf16>,
    %c0_21 = arith.constant 0 : index
    %c0_22 = arith.constant 0 : index
    %23 = vector.load %arg5[%c0_21, %c0_22] : memref<128x384xbf16, #tpu.memory_space<vmem>>, vector<128x384xbf16>
    %c0_23 = arith.constant 0 : index
    %c0_24 = arith.constant 0 : index
    %24 = vector.load %arg9[%c0_23, %c0_24] : memref<128x384xbf16, #tpu.memory_space<vmem>>, vector<128x384xbf16>
    %c0_25 = arith.constant 0 : index
    %c0_26 = arith.constant 0 : index
    %25 = vector.load %arg7[%c0_25, %c0_26] : memref<1x128xf32, #tpu.memory_space<vmem>>, vector<1x128xf32>
    %c0_27 = arith.constant 0 : index
    %c0_28 = arith.constant 0 : index
    %26 = vector.load %arg11[%c0_27, %c0_28] : memref<1x128xf32, #tpu.memory_space<vmem>>, vector<1x128xf32>
    %c0_29 = arith.constant 0 : index
    %c0_30 = arith.constant 0 : index
    %27 = vector.load %arg21[%c0_29, %c0_30] : memref<8x128xf32, #tpu.memory_space<vmem>>, vector<8x128xf32>
    %c0_31 = arith.constant 0 : index
    %c0_32 = arith.constant 0 : index
    %28 = vector.load %arg22[%c0_31, %c0_32] : memref<8x128xf32, #tpu.memory_space<vmem>>, vector<8x128xf32>
    %c0_i32_33 = arith.constant 0 : i32
    %c8_i32 = arith.constant 8 : i32
    %29 = arith.addi %c0_i32_33, %c8_i32 : i32
    %c1_i32 = arith.constant 1 : i32
    %30:2 = scf.for %arg23 = %c0_i32_33 to %29 step %c1_i32 iter_args(%arg24 = %27, %arg25 = %28) -> (vector<8x128xf32>, vector<8x128xf32>)  : i32 {
      %c7_i32 = arith.constant 7 : i32
      %48 = arith.subi %c7_i32, %arg23 : i32
      %49 = arith.index_cast %arg23 : i32 to index
      %c0_59 = arith.constant 0 : index
      %c0_60 = arith.constant 0 : index
      %50 = vector.load %arg17[%49, %c0_59, %c0_60] : memref<8x8x384xbf16, #tpu.memory_space<vmem>>, vector<1x8x384xbf16>
      %51 = vector.shape_cast %50 : vector<1x8x384xbf16> to vector<8x384xbf16>
      %52 = arith.truncf %arg24 : vector<8x128xf32> to vector<8x128xbf16>
      %cst_61 = arith.constant dense<0.000000e+00> : vector<8x384xf32>
      %53 = tpu.matmul %52, %23, %cst_61 {dimension_numbers = #tpu.dot_dimension_numbers<[1], [0], [0], [1], [0, 0, 1, 1], [], []>} : vector<8x128xbf16>, vector<128x384xbf16>, vector<8x384xf32> -> vector<8x384xf32>
      %54 = vector.extract_strided_slice %51 {offsets = [0, 0], sizes = [8, 128], strides = [1, 1]} : vector<8x384xbf16> to vector<8x128xbf16>
      %55 = vector.extract_strided_slice %53 {offsets = [0, 0], sizes = [8, 128], strides = [1, 1]} : vector<8x384xf32> to vector<8x128xf32>
      %56 = arith.extf %54 : vector<8x128xbf16> to vector<8x128xf32>
      %57 = arith.addf %56, %55 : vector<8x128xf32>
      %58 = arith.negf %57 : vector<8x128xf32>
      %59 = math.exp %58 : vector<8x128xf32>
      %cst_62 = arith.constant 1.000000e+00 : f32
      %60 = vector.broadcast %cst_62 : f32 to vector<8x128xf32>
      %61 = arith.addf %60, %59 : vector<8x128xf32>
      %62 = arith.divf %60, %61 : vector<8x128xf32>
      %63 = vector.extract_strided_slice %51 {offsets = [0, 128], sizes = [8, 128], strides = [1, 1]} : vector<8x384xbf16> to vector<8x128xbf16>
      %64 = vector.extract_strided_slice %53 {offsets = [0, 128], sizes = [8, 128], strides = [1, 1]} : vector<8x384xf32> to vector<8x128xf32>
      %65 = arith.extf %63 : vector<8x128xbf16> to vector<8x128xf32>
      %66 = arith.addf %65, %64 : vector<8x128xf32>
      %67 = arith.negf %66 : vector<8x128xf32>
      %68 = math.exp %67 : vector<8x128xf32>
      %cst_63 = arith.constant 1.000000e+00 : f32
      %69 = vector.broadcast %cst_63 : f32 to vector<8x128xf32>
      %70 = arith.addf %69, %68 : vector<8x128xf32>
      %71 = arith.divf %69, %70 : vector<8x128xf32>
      %72 = vector.extract_strided_slice %51 {offsets = [0, 256], sizes = [8, 128], strides = [1, 1]} : vector<8x384xbf16> to vector<8x128xbf16>
      %73 = vector.extract_strided_slice %53 {offsets = [0, 256], sizes = [8, 128], strides = [1, 1]} : vector<8x384xf32> to vector<8x128xf32>
      %74 = vector.broadcast %25 : vector<1x128xf32> to vector<8x128xf32>
      %75 = arith.addf %73, %74 : vector<8x128xf32>
      %76 = arith.mulf %62, %75 : vector<8x128xf32>
      %77 = arith.extf %72 : vector<8x128xbf16> to vector<8x128xf32>
      %78 = arith.addf %77, %76 : vector<8x128xf32>
      %79 = math.tanh %78 : vector<8x128xf32>
      %cst_64 = arith.constant 1.000000e+00 : f32
      %80 = vector.broadcast %cst_64 : f32 to vector<8x128xf32>
      %81 = arith.subf %80, %71 : vector<8x128xf32>
      %82 = arith.mulf %81, %79 : vector<8x128xf32>
      %83 = arith.mulf %71, %arg24 : vector<8x128xf32>
      %84 = arith.addf %82, %83 : vector<8x128xf32>
      %85 = arith.index_cast %48 : i32 to index
      %c0_65 = arith.constant 0 : index
      %c0_66 = arith.constant 0 : index
      %86 = vector.load %arg18[%85, %c0_65, %c0_66] : memref<8x8x384xbf16, #tpu.memory_space<vmem>>, vector<1x8x384xbf16>
      %87 = vector.shape_cast %86 : vector<1x8x384xbf16> to vector<8x384xbf16>
      %88 = arith.truncf %arg25 : vector<8x128xf32> to vector<8x128xbf16>
      %cst_67 = arith.constant dense<0.000000e+00> : vector<8x384xf32>
      %89 = tpu.matmul %88, %24, %cst_67 {dimension_numbers = #tpu.dot_dimension_numbers<[1], [0], [0], [1], [0, 0, 1, 1], [], []>} : vector<8x128xbf16>, vector<128x384xbf16>, vector<8x384xf32> -> vector<8x384xf32>
      %90 = vector.extract_strided_slice %87 {offsets = [0, 0], sizes = [8, 128], strides = [1, 1]} : vector<8x384xbf16> to vector<8x128xbf16>
      %91 = vector.extract_strided_slice %89 {offsets = [0, 0], sizes = [8, 128], strides = [1, 1]} : vector<8x384xf32> to vector<8x128xf32>
      %92 = arith.extf %90 : vector<8x128xbf16> to vector<8x128xf32>
      %93 = arith.addf %92, %91 : vector<8x128xf32>
      %94 = arith.negf %93 : vector<8x128xf32>
      %95 = math.exp %94 : vector<8x128xf32>
      %cst_68 = arith.constant 1.000000e+00 : f32
      %96 = vector.broadcast %cst_68 : f32 to vector<8x128xf32>
      %97 = arith.addf %96, %95 : vector<8x128xf32>
      %98 = arith.divf %96, %97 : vector<8x128xf32>
      %99 = vector.extract_strided_slice %87 {offsets = [0, 128], sizes = [8, 128], strides = [1, 1]} : vector<8x384xbf16> to vector<8x128xbf16>
      %100 = vector.extract_strided_slice %89 {offsets = [0, 128], sizes = [8, 128], strides = [1, 1]} : vector<8x384xf32> to vector<8x128xf32>
      %101 = arith.extf %99 : vector<8x128xbf16> to vector<8x128xf32>
      %102 = arith.addf %101, %100 : vector<8x128xf32>
      %103 = arith.negf %102 : vector<8x128xf32>
      %104 = math.exp %103 : vector<8x128xf32>
      %cst_69 = arith.constant 1.000000e+00 : f32
      %105 = vector.broadcast %cst_69 : f32 to vector<8x128xf32>
      %106 = arith.addf %105, %104 : vector<8x128xf32>
      %107 = arith.divf %105, %106 : vector<8x128xf32>
      %108 = vector.extract_strided_slice %87 {offsets = [0, 256], sizes = [8, 128], strides = [1, 1]} : vector<8x384xbf16> to vector<8x128xbf16>
      %109 = vector.extract_strided_slice %89 {offsets = [0, 256], sizes = [8, 128], strides = [1, 1]} : vector<8x384xf32> to vector<8x128xf32>
      %110 = vector.broadcast %26 : vector<1x128xf32> to vector<8x128xf32>
      %111 = arith.addf %109, %110 : vector<8x128xf32>
      %112 = arith.mulf %98, %111 : vector<8x128xf32>
      %113 = arith.extf %108 : vector<8x128xbf16> to vector<8x128xf32>
      %114 = arith.addf %113, %112 : vector<8x128xf32>
      %115 = math.tanh %114 : vector<8x128xf32>
      %cst_70 = arith.constant 1.000000e+00 : f32
      %116 = vector.broadcast %cst_70 : f32 to vector<8x128xf32>
      %117 = arith.subf %116, %107 : vector<8x128xf32>
      %118 = arith.mulf %117, %115 : vector<8x128xf32>
      %119 = arith.mulf %107, %arg25 : vector<8x128xf32>
      %120 = arith.addf %118, %119 : vector<8x128xf32>
      %121 = arith.truncf %84 : vector<8x128xf32> to vector<8x128xbf16>
      %122 = arith.index_cast %arg23 : i32 to index
      %c0_71 = arith.constant 0 : index
      %c0_72 = arith.constant 0 : index
      %123 = vector.load %arg19[%122, %c0_71, %c0_72] : memref<8x8x128xbf16, #tpu.memory_space<vmem>>, vector<1x8x128xbf16>
      %124 = vector.shape_cast %123 : vector<1x8x128xbf16> to vector<8x128xbf16>
      %125 = vector.shape_cast %121 : vector<8x128xbf16> to vector<1x8x128xbf16>
      tpu.vector_store %arg19[%122, %c0_71, %c0_72], %125 {strides = array<i32>} : memref<8x8x128xbf16, #tpu.memory_space<vmem>>, vector<1x8x128xbf16>,
      %126 = arith.truncf %120 : vector<8x128xf32> to vector<8x128xbf16>
      %127 = arith.index_cast %48 : i32 to index
      %c0_73 = arith.constant 0 : index
      %c0_74 = arith.constant 0 : index
      %128 = vector.load %arg20[%127, %c0_73, %c0_74] : memref<8x8x128xbf16, #tpu.memory_space<vmem>>, vector<1x8x128xbf16>
      %129 = vector.shape_cast %128 : vector<1x8x128xbf16> to vector<8x128xbf16>
      %130 = vector.shape_cast %126 : vector<8x128xbf16> to vector<1x8x128xbf16>
      tpu.vector_store %arg20[%127, %c0_73, %c0_74], %130 {strides = array<i32>} : memref<8x8x128xbf16, #tpu.memory_space<vmem>>, vector<1x8x128xbf16>,
      scf.yield %84, %120 : vector<8x128xf32>, vector<8x128xf32>
    }
    %c8_i32_34 = arith.constant 8 : i32
    %c0_35 = arith.constant 0 : index
    %c0_36 = arith.constant 0 : index
    %31 = vector.load %arg21[%c0_35, %c0_36] : memref<8x128xf32, #tpu.memory_space<vmem>>, vector<8x128xf32>
    tpu.vector_store %arg21[%c0_35, %c0_36], %30#0 {strides = array<i32>} : memref<8x128xf32, #tpu.memory_space<vmem>>, vector<8x128xf32>,
    %c0_37 = arith.constant 0 : index
    %c0_38 = arith.constant 0 : index
    %32 = vector.load %arg22[%c0_37, %c0_38] : memref<8x128xf32, #tpu.memory_space<vmem>>, vector<8x128xf32>
    tpu.vector_store %arg22[%c0_37, %c0_38], %30#1 {strides = array<i32>} : memref<8x128xf32, #tpu.memory_space<vmem>>, vector<8x128xf32>,
    %c0_39 = arith.constant 0 : index
    %c0_40 = arith.constant 0 : index
    %c0_41 = arith.constant 0 : index
    %33 = vector.load %arg19[%c0_39, %c0_40, %c0_41] : memref<8x8x128xbf16, #tpu.memory_space<vmem>>, vector<8x8x128xbf16>
    %34 = vector.shape_cast %33 : vector<8x8x128xbf16> to vector<64x128xbf16>
    %c0_42 = arith.constant 0 : index
    %c0_43 = arith.constant 0 : index
    %35 = vector.load %arg12[%c0_42, %c0_43] : memref<128x128xbf16, #tpu.memory_space<vmem>>, vector<128x128xbf16>
    %cst_44 = arith.constant dense<0.000000e+00> : vector<64x128xf32>
    %36 = tpu.matmul %34, %35, %cst_44 {dimension_numbers = #tpu.dot_dimension_numbers<[1], [0], [0], [1], [0, 0, 1, 1], [], []>} : vector<64x128xbf16>, vector<128x128xbf16>, vector<64x128xf32> -> vector<64x128xf32>
    %c0_45 = arith.constant 0 : index
    %c0_46 = arith.constant 0 : index
    %37 = vector.load %arg14[%c0_45, %c0_46] : memref<1x128xf32, #tpu.memory_space<vmem>>, vector<1x128xf32>
    %38 = vector.broadcast %37 : vector<1x128xf32> to vector<64x128xf32>
    %39 = arith.addf %36, %38 : vector<64x128xf32>
    %40 = vector.shape_cast %39 : vector<64x128xf32> to vector<8x8x128xf32>
    %c0_47 = arith.constant 0 : index
    %c0_48 = arith.constant 0 : index
    %c0_49 = arith.constant 0 : index
    %41 = vector.load %arg15[%c0_47, %c0_48, %c0_49] : memref<8x8x128xf32, #tpu.memory_space<vmem>>, vector<8x8x128xf32>
    tpu.vector_store %arg15[%c0_47, %c0_48, %c0_49], %40 {strides = array<i32>} : memref<8x8x128xf32, #tpu.memory_space<vmem>>, vector<8x8x128xf32>,
    %c0_50 = arith.constant 0 : index
    %c0_51 = arith.constant 0 : index
    %c0_52 = arith.constant 0 : index
    %42 = vector.load %arg20[%c0_50, %c0_51, %c0_52] : memref<8x8x128xbf16, #tpu.memory_space<vmem>>, vector<8x8x128xbf16>
    %43 = vector.shape_cast %42 : vector<8x8x128xbf16> to vector<64x128xbf16>
    %c0_53 = arith.constant 0 : index
    %c0_54 = arith.constant 0 : index
    %44 = vector.load %arg13[%c0_53, %c0_54] : memref<128x128xbf16, #tpu.memory_space<vmem>>, vector<128x128xbf16>
    %cst_55 = arith.constant dense<0.000000e+00> : vector<64x128xf32>
    %45 = tpu.matmul %43, %44, %cst_55 {dimension_numbers = #tpu.dot_dimension_numbers<[1], [0], [0], [1], [0, 0, 1, 1], [], []>} : vector<64x128xbf16>, vector<128x128xbf16>, vector<64x128xf32> -> vector<64x128xf32>
    %46 = vector.shape_cast %45 : vector<64x128xf32> to vector<8x8x128xf32>
    %c0_56 = arith.constant 0 : index
    %c0_57 = arith.constant 0 : index
    %c0_58 = arith.constant 0 : index
    %47 = vector.load %arg16[%c0_56, %c0_57, %c0_58] : memref<8x8x128xf32, #tpu.memory_space<vmem>>, vector<8x8x128xf32>
    tpu.vector_store %arg16[%c0_56, %c0_57, %c0_58], %46 {strides = array<i32>} : memref<8x8x128xf32, #tpu.memory_space<vmem>>, vector<8x8x128xf32>,
    return
  }
  func.func @transform_0(%arg0: i32, %arg1: i32) -> (i32, i32, i32) {
    %c0_i32 = arith.constant 0 : i32
    %c0_i32_0 = arith.constant 0 : i32
    return %arg1, %arg0, %c0_i32 : i32, i32, i32
  }
  func.func @transform_1(%arg0: i32, %arg1: i32) -> (i32, i32, i32) {
    %c0_i32 = arith.constant 0 : i32
    %0 = arith.subi %c0_i32, %arg1 : i32
    %c0_i32_0 = arith.constant 0 : i32
    %c0_i32_1 = arith.constant 0 : i32
    return %0, %arg0, %c0_i32_0 : i32, i32, i32
  }
  func.func @transform_2(%arg0: i32, %arg1: i32) -> (i32, i32) {
    %c0_i32 = arith.constant 0 : i32
    %c0_i32_0 = arith.constant 0 : i32
    %c0_i32_1 = arith.constant 0 : i32
    return %c0_i32, %c0_i32_0 : i32, i32
  }
  func.func @transform_3(%arg0: i32, %arg1: i32) -> (i32, i32) {
    %c0_i32 = arith.constant 0 : i32
    %c0_i32_0 = arith.constant 0 : i32
    %c0_i32_1 = arith.constant 0 : i32
    return %c0_i32, %c0_i32_0 : i32, i32
  }
  func.func @transform_4(%arg0: i32, %arg1: i32) -> (i32, i32) {
    %c0_i32 = arith.constant 0 : i32
    %c0_i32_0 = arith.constant 0 : i32
    %c0_i32_1 = arith.constant 0 : i32
    return %c0_i32, %c0_i32_0 : i32, i32
  }
  func.func @transform_5(%arg0: i32, %arg1: i32) -> (i32, i32) {
    %c0_i32 = arith.constant 0 : i32
    %c0_i32_0 = arith.constant 0 : i32
    %c0_i32_1 = arith.constant 0 : i32
    return %c0_i32, %c0_i32_0 : i32, i32
  }
  func.func @transform_6(%arg0: i32, %arg1: i32) -> (i32, i32) {
    %c0_i32 = arith.constant 0 : i32
    %c0_i32_0 = arith.constant 0 : i32
    %c0_i32_1 = arith.constant 0 : i32
    return %c0_i32, %c0_i32_0 : i32, i32
  }
  func.func @transform_7(%arg0: i32, %arg1: i32) -> (i32, i32) {
    %c0_i32 = arith.constant 0 : i32
    %c0_i32_0 = arith.constant 0 : i32
    %c0_i32_1 = arith.constant 0 : i32
    return %c0_i32, %c0_i32_0 : i32, i32
  }
  func.func @transform_8(%arg0: i32, %arg1: i32) -> (i32, i32) {
    %c0_i32 = arith.constant 0 : i32
    %c0_i32_0 = arith.constant 0 : i32
    %c0_i32_1 = arith.constant 0 : i32
    return %c0_i32, %c0_i32_0 : i32, i32
  }
  func.func @transform_9(%arg0: i32, %arg1: i32) -> (i32, i32) {
    %c0_i32 = arith.constant 0 : i32
    %c0_i32_0 = arith.constant 0 : i32
    %c0_i32_1 = arith.constant 0 : i32
    return %c0_i32, %c0_i32_0 : i32, i32
  }
  func.func @transform_10(%arg0: i32, %arg1: i32) -> (i32, i32) {
    %c0_i32 = arith.constant 0 : i32
    %c0_i32_0 = arith.constant 0 : i32
    %c0_i32_1 = arith.constant 0 : i32
    return %c0_i32, %c0_i32_0 : i32, i32
  }
  func.func @transform_11(%arg0: i32, %arg1: i32) -> (i32, i32) {
    %c0_i32 = arith.constant 0 : i32
    %c0_i32_0 = arith.constant 0 : i32
    %c0_i32_1 = arith.constant 0 : i32
    return %c0_i32, %c0_i32_0 : i32, i32
  }
  func.func @transform_12(%arg0: i32, %arg1: i32) -> (i32, i32) {
    %c0_i32 = arith.constant 0 : i32
    %c0_i32_0 = arith.constant 0 : i32
    %c0_i32_1 = arith.constant 0 : i32
    return %c0_i32, %c0_i32_0 : i32, i32
  }
  func.func @transform_13(%arg0: i32, %arg1: i32) -> (i32, i32, i32) {
    %c0_i32 = arith.constant 0 : i32
    %c0_i32_0 = arith.constant 0 : i32
    return %arg1, %arg0, %c0_i32 : i32, i32, i32
  }
  func.func @transform_14(%arg0: i32, %arg1: i32) -> (i32, i32, i32) {
    %c0_i32 = arith.constant 0 : i32
    %0 = arith.subi %c0_i32, %arg1 : i32
    %c0_i32_0 = arith.constant 0 : i32
    %c0_i32_1 = arith.constant 0 : i32
    return %0, %arg0, %c0_i32_0 : i32, i32, i32
  }
}

</mosaic_0001>

<bundles_post_ra>
// kernel: universal_rnn_forward.1
= control target key start
LH: loop header
LB: loop body
LE: loop exit
PB: predicated region body
PF: predicated region fallthrough
CT: control target
= control target key end

     0   :  { %v2584_v1 = vmov 0   ;;  %s3491_s2 = inlined_call_operand.vmem [shape: bf16[128,384], index: 2, kind: input, shape index: {}]   ;;  %s3492_s10 = inlined_call_operand.vmem [shape: bf16[128,128], index: 10, kind: input, shape index: {}]   ;;  %s3493_s11 = inlined_call_operand.vmem [shape: bf16[128,128], index: 11, kind: input, shape index: {}]   ;;  %s3494_s12 = inlined_call_operand.vmem [shape: f32[1,128], index: 12, kind: input, shape index: {}]   ;;  %s3495_s13 = inlined_call_operand.vmem [shape: f32[8,8,128], index: 13, kind: output, shape index: {0}]   ;;  %s3496_s14 = inlined_call_operand.vmem [shape: f32[8,8,128], index: 14, kind: output, shape index: {1}]   ;;  %s3497_s0 = inlined_call_operand.vmem [shape: bf16[8,8,128], index: 0, kind: input, shape index: {}, may-alias: {0,1}]   ;;  %s3498_s6 = inlined_call_operand.vmem [shape: bf16[128,384], index: 6, kind: input, shape index: {}]   ;;  %s3499_s1 = inlined_call_operand.vmem [shape: bf16[8,8,128], index: 1, kind: input, shape index: {}, may-alias: {0,1}]   ;;  %s3500_s3 = inlined_call_operand.vmem [shape: bf16[128,384], index: 3, kind: input, shape index: {}]   ;;  %s3501_s7 = inlined_call_operand.vmem [shape: bf16[128,384], index: 7, kind: input, shape index: {}]   ;;  %s3502_s5 = inlined_call_operand.vmem [shape: f32[1,128], index: 5, kind: input, shape index: {}]   ;;  %s3503_s9 = inlined_call_operand.vmem [shape: f32[1,128], index: 9, kind: input, shape index: {}]   ;;  %s3504_s4 = inlined_call_operand.vmem [shape: f32[1,384], index: 4, kind: input, shape index: {}]   ;;  %s3505_s8 = inlined_call_operand.vmem [shape: f32[1,384], index: 8, kind: input, shape index: {}]  }
   0x1   :  { %v2444_v0 = vld [vmem:[%s3491_s2 + $0x4] ss:$12 sps:$4 sm:$0xff]   ;;  %330 = vmatprep.mubr.bf16.mxu0 %v2584_v1  ;;  %v2446_v2 = vld [vmem:[%s3491_s2] ss:$12 sps:$4 sm:$0xff]   ;;  %v2447_v3 = vld [vmem:[%s3491_s2 + $0x1c] ss:$12 sps:$4 sm:$0xff]  }
   0x2   :  { %298 = vmatprep.subr.bf16.mxu0 %v2444_v0  ;;  %v2449_v4 = vld [vmem:[%s3491_s2 + $0x18] ss:$12 sps:$4 sm:$0xff]   ;;  %v2450_v5 = vld [vmem:[%s3491_s2 + $0x34] ss:$12 sps:$4 sm:$0xff]   ;;  %v2452_v7 = vld [vmem:[%s3491_s2 + $0x30] ss:$12 sps:$4 sm:$0xff]  }
   0x3   :  { %299 = vmatpush1.bf16.msra.mxu0 %v2446_v2  ;;  %v2456_v6 = vld [vmem:[%s3491_s2 + $0x8] ss:$12 sps:$4 sm:$0xff]   ;;  %v2453_v8 = vld [vmem:[%s3491_s2 + $0x4c] ss:$12 sps:$4 sm:$0xff]   ;;  %v2457_v12 = vld [vmem:[%s3491_s2 + $0x64] ss:$12 sps:$4 sm:$0xff]  }
   0x4   :  { %300 = vmatprep.subr.bf16.mxu0 %v2447_v3  ;;  %2279 = vmatprep.subr.bf16.mxu1 %v2456_v6  ;;  %v2460_v9 = vld [vmem:[%s3491_s2 + $0x20] ss:$12 sps:$4 sm:$0xff]   ;;  %v2464_v10 = vld [vmem:[%s3491_s2 + $0x38] ss:$12 sps:$4 sm:$0xff]   ;;  %v2455_v11 = vld [vmem:[%s3491_s2 + $0x48] ss:$12 sps:$4 sm:$0xff]  }
   0x5   :  { %2280 = vmatpush3.bf16.msra.mxu1 %v2456_v6  ;;  %v2459_v13 = vld [vmem:[%s3491_s2 + $0x60] ss:$12 sps:$4 sm:$0xff]   ;;  %v2468_v14 = vld [vmem:[%s3491_s2 + $0x50] ss:$12 sps:$4 sm:$0xff]   ;;  %v2472_v17 = vld [vmem:[%s3491_s2 + $0x68] ss:$12 sps:$4 sm:$0xff]  }
   0x6   :  { %2281 = vmatprep.subr.bf16.mxu1 %v2460_v9  ;;  %v2461_v15 = vld [vmem:[%s3491_s2 + $0x7c] ss:$12 sps:$4 sm:$0xff]   ;;  %v2473_v16 = vld [vmem:[%s3497_s0] sm:$0xff]   ;;  %v2469_v22 = vld [vmem:[%s3491_s2 + $0xac] ss:$12 sps:$4 sm:$0xff]  }
   0x7   :  { %301 = vmatpush1.bf16.msra.mxu0 %v2449_v4  ;;  %2295 = vmatprep.mubr.bf16.mxu1 %v2473_v16  ;;  %v2463_v18 = vld [vmem:[%s3491_s2 + $0x78] ss:$12 sps:$4 sm:$0xff]   ;;  %v2465_v19 = vld [vmem:[%s3491_s2 + $0x94] ss:$12 sps:$4 sm:$0xff]   ;;  %v2467_v21 = vld [vmem:[%s3491_s2 + $0x90] ss:$12 sps:$4 sm:$0xff]  }
   0x8   :  { %302 = vmatprep.subr.bf16.mxu0 %v2450_v5  ;;  %v2477_v20 = vld [vmem:[%s3491_s2 + $0x80] ss:$12 sps:$4 sm:$0xff]   ;;  %v2481_v23 = vld [vmem:[%s3491_s2 + $0x98] ss:$12 sps:$4 sm:$0xff]   ;;  %v2471_v24 = vld [vmem:[%s3491_s2 + $0xa8] ss:$12 sps:$4 sm:$0xff]  }
   0x9   :  { %2282 = vmatpush3.bf16.msra.mxu1 %v2460_v9  ;;  %v2476_v25 = vld [vmem:[%s3498_s6 + $0x4] ss:$12 sps:$4 sm:$0xff]   ;;  %v2474_v27 = vld [vmem:[%s3498_s6] ss:$12 sps:$4 sm:$0xff]   ;;  %v2480_v28 = vld [vmem:[%s3498_s6 + $0x1c] ss:$12 sps:$4 sm:$0xff]  }
   0xa   :  { %2283 = vmatprep.subr.bf16.mxu1 %v2464_v10  ;;  %v2486_v26 = vld [vmem:[%s3491_s2 + $0xb0] ss:$12 sps:$4 sm:$0xff]   ;;  %v2490_v29 = vld [vmem:[%s3498_s6 + $0x8] ss:$12 sps:$4 sm:$0xff]   ;;  %v2478_v30 = vld [vmem:[%s3498_s6 + $0x18] ss:$12 sps:$4 sm:$0xff]  }
   0xb   :  { %303 = vmatpush1.bf16.msra.mxu0 %v2452_v7  ;;  %v2482_v31 = vld [vmem:[%s3497_s0 + $0x8] sm:$0xff]   ;;  %v2485_v32 = vld [vmem:[%s3498_s6 + $0x34] ss:$12 sps:$4 sm:$0xff]   ;;  %v2483_v33 = vld [vmem:[%s3498_s6 + $0x30] ss:$12 sps:$4 sm:$0xff]  }
   0xc   :  { %304 = vmatprep.subr.bf16.mxu0 %v2453_v8  ;;  %v2495_v34 = vld [vmem:[%s3498_s6 + $0x20] ss:$12 sps:$4 sm:$0xff]   ;;  %v2491_v35 = vld [vmem:[%s3497_s0 + $0x10] sm:$0xff]   ;;  %v2499_v37 = vld [vmem:[%s3498_s6 + $0x38] ss:$12 sps:$4 sm:$0xff]  }
   0xd   :  { %2284 = vmatpush3.bf16.msra.mxu1 %v2464_v10  ;;  %v2489_v36 = vld [vmem:[%s3498_s6 + $0x4c] ss:$12 sps:$4 sm:$0xff]   ;;  %v2487_v38 = vld [vmem:[%s3498_s6 + $0x48] ss:$12 sps:$4 sm:$0xff]   ;;  %v2494_v39 = vld [vmem:[%s3498_s6 + $0x64] ss:$12 sps:$4 sm:$0xff]  }
   0xe   :  { %2285 = vmatprep.subr.bf16.mxu1 %v2468_v14  ;;  %v2500_v40 = vld [vmem:[%s3497_s0 + $0x18] sm:$0xff]   ;;  %v2492_v42 = vld [vmem:[%s3498_s6 + $0x60] ss:$12 sps:$4 sm:$0xff]   ;;  %v2508_v45 = vld [vmem:[%s3498_s6 + $0x68] ss:$12 sps:$4 sm:$0xff]  }
   0xf   :  { %305 = vmatpush1.bf16.msra.mxu0 %v2455_v11  ;;  %v2504_v41 = vld [vmem:[%s3498_s6 + $0x50] ss:$12 sps:$4 sm:$0xff]   ;;  %v2509_v43 = vld [vmem:[%s3499_s1] sm:$0xff]   ;;  %v2507_v50 = vld [vmem:[%s3498_s6 + $0xac] ss:$12 sps:$4 sm:$0xff]  }
  0x10   :  { %306 = vmatprep.subr.bf16.mxu0 %v2457_v12  ;;  %v2498_v44 = vld [vmem:[%s3498_s6 + $0x7c] ss:$12 sps:$4 sm:$0xff]   ;;  %v2496_v46 = vld [vmem:[%s3498_s6 + $0x78] ss:$12 sps:$4 sm:$0xff]   ;;  %v2503_v47 = vld [vmem:[%s3498_s6 + $0x94] ss:$12 sps:$4 sm:$0xff]  }
  0x11   :  { %2286 = vmatpush3.bf16.msra.mxu1 %v2468_v14  ;;  %v2510_v48 = vld [vmem:[%s3498_s6 + $0x80] ss:$12 sps:$4 sm:$0xff]   ;;  %v2501_v49 = vld [vmem:[%s3498_s6 + $0x90] ss:$12 sps:$4 sm:$0xff]   ;;  %v2511_v51 = vld [vmem:[%s3498_s6 + $0x98] ss:$12 sps:$4 sm:$0xff]  }
  0x12   :  { %2287 = vmatprep.subr.bf16.mxu1 %v2472_v17  ;;  %v2505_v52 = vld [vmem:[%s3498_s6 + $0xa8] ss:$12 sps:$4 sm:$0xff]   ;;  %v2513_v53 = vld [vmem:[%s3498_s6 + $0xb0] ss:$12 sps:$4 sm:$0xff]   ;;  %v2842_v57 = vld [vmem:[%s3500_s3] sm:$0xff] }
  0x13   :  { %307 = vmatpush1.bf16.msra.mxu0 %v2459_v13  ;;  %v2512_v54 = vld [vmem:[%s3499_s1 + $0x8] sm:$0xff]   ;;  %v2514_v55 = vld [vmem:[%s3499_s1 + $0x10] sm:$0xff]   ;;  %v2515_v56 = vld [vmem:[%s3499_s1 + $0x18] sm:$0xff]  }
  0x14   :  { %308 = vmatprep.subr.bf16.mxu0 %v2461_v15  ;;  %v2847_v58 = vld [vmem:[%s3500_s3 + $0x8] sm:$0xf]  ;;  %v2852_v59 = vld [vmem:[%s3500_s3 + $0xc] sm:$0xff]  ;;  %v2857_v60 = vld [vmem:[%s3500_s3 + $0x14] sm:$0xf] }
  0x15   :  { %2288 = vmatpush3.bf16.msra.mxu1 %v2472_v17  ;;  %v2862_v61 = vld [vmem:[%s3500_s3 + $0x18] sm:$0xff]  ;;  %v2867_v62 = vld [vmem:[%s3500_s3 + $0x20] sm:$0xf]  ;;  %v2872_v63 = vld [vmem:[%s3500_s3 + $0x24] sm:$0xff] }
  0x16   :  { %2289 = vmatprep.subr.bf16.mxu1 %v2477_v20  ;;  %v2877_v0 = vld [vmem:[%s3500_s3 + $0x2c] sm:$0xf]  ;;  %v2887_v2 = vld [vmem:[%s3500_s3 + $0x38] sm:$0xf]  ;;  %v2892_v3 = vld [vmem:[%s3500_s3 + $0x3c] sm:$0xff] }
  0x17   :  { %309 = vmatpush1.bf16.msra.mxu0 %v2463_v18  ;;  %3524 = vst [vmem:[#allocation8_spill] sm:$0xff] %v2877_v0  ;;  %3526 = vst [vmem:[#allocation10_spill] sm:$0xff] %v2887_v2  ;;  %v2897_v4 = vld [vmem:[%s3500_s3 + $0x44] sm:$0xf]  ;;  %v2902_v5 = vld [vmem:[%s3500_s3 + $0x48] sm:$0xff] }
  0x18   :  { %310 = vmatprep.subr.bf16.mxu0 %v2465_v19  ;;  %3527 = vst [vmem:[#allocation11_spill] sm:$0xff] %v2892_v3  ;;  %3528 = vst [vmem:[#allocation12_spill] sm:$0xff] %v2897_v4  ;;  %v2907_v6 = vld [vmem:[%s3500_s3 + $0x50] sm:$0xf]  ;;  %v2912_v7 = vld [vmem:[%s3500_s3 + $0x54] sm:$0xff] }
  0x19   :  { %2290 = vmatpush3.bf16.msra.mxu1 %v2477_v20  ;;  %3529 = vst [vmem:[#allocation13_spill] sm:$0xff] %v2902_v5  ;;  %3530 = vst [vmem:[#allocation14_spill] sm:$0xff] %v2907_v6  ;;  %v2917_v8 = vld [vmem:[%s3500_s3 + $0x5c] sm:$0xf]  ;;  %v2922_v9 = vld [vmem:[%s3500_s3 + $0x60] sm:$0xff] }
  0x1a   :  { %2291 = vmatprep.subr.bf16.mxu1 %v2481_v23  ;;  %3531 = vst [vmem:[#allocation15_spill] sm:$0xff] %v2912_v7  ;;  %3532 = vst [vmem:[#allocation16_spill] sm:$0xff] %v2917_v8  ;;  %v2927_v10 = vld [vmem:[%s3500_s3 + $0x68] sm:$0xf]  ;;  %v2932_v11 = vld [vmem:[%s3500_s3 + $0x6c] sm:$0xff] }
  0x1b   :  { %311 = vmatpush1.bf16.msra.mxu0 %v2467_v21  ;;  %3533 = vst [vmem:[#allocation17_spill] sm:$0xff] %v2922_v9  ;;  %v2937_v12 = vld [vmem:[%s3500_s3 + $0x74] sm:$0xf]  ;;  %v2942_v13 = vld [vmem:[%s3500_s3 + $0x78] sm:$0xff]  ;;  %v2947_v14 = vld [vmem:[%s3500_s3 + $0x80] sm:$0xf] }
  0x1c   :  { %312 = vmatprep.subr.bf16.mxu0 %v2469_v22  ;;  %v2952_v15 = vld [vmem:[%s3500_s3 + $0x84] sm:$0xff]  ;;  %v2962_v17 = vld [vmem:[%s3500_s3 + $0x90] sm:$0xff]  ;;  %v2967_v18 = vld [vmem:[%s3500_s3 + $0x98] sm:$0xf] }
  0x1d   :  { %2292 = vmatpush3.bf16.msra.mxu1 %v2481_v23  ;;  %v2972_v19 = vld [vmem:[%s3500_s3 + $0x9c] sm:$0xff]  ;;  %v2977_v20 = vld [vmem:[%s3500_s3 + $0xa4] sm:$0xf]  ;;  %v2982_v21 = vld [vmem:[%s3500_s3 + $0xa8] sm:$0xff] }
  0x1e   :  { %2293 = vmatprep.subr.bf16.mxu1 %v2486_v26  ;;  %v2987_v22 = vld [vmem:[%s3500_s3 + $0xb0] sm:$0xf]  ;;  %v2992_v23 = vld [vmem:[%s3500_s3 + $0xb4] sm:$0xff] }
  0x1f   :  { %313 = vmatpush1.bf16.msra.mxu0 %v2471_v24  ;;  %v2997_v24 = vld [vmem:[%s3500_s3 + $0xbc] sm:$0xf] }
  0x20   :  { %765 = vmatprep.subr.bf16.mxu0 %v2476_v25  ;;  %v3002_v25 = vld [vmem:[%s3501_s7] sm:$0xff] }
  0x21   :  { %2294 = vmatpush3.bf16.msra.mxu1 %v2486_v26  ;;  %v3007_v26 = vld [vmem:[%s3501_s7 + $0x8] sm:$0xf] }
  0x22   :  { %331 = vmatmul.mubr.bf16.vlgmr.msra.gmra.mrb[0].mxu0 %v2473_v16  ;;  %2303 = vmatprep.subr.bf16.mxu1 %v2490_v29  ;;  %v2957_v16 = vld [vmem:[%s3500_s3 + $0x8c] sm:$0xf] }
  0x23   :  { %766 = vmatpush1.bf16.msra.mxu0 %v2474_v27  ;;  %340 = vmatprep.mubr.bf16.mxu0 %v2584_v1  ;;  %v3012_v27 = vld [vmem:[%s3501_s7 + $0xc] sm:$0xff] }
  0x24   :  { %767 = vmatprep.subr.bf16.mxu0 %v2480_v28  ;;  %2296 = vmatmul.mubr.bf16.vlgmr.msra.gmra.mrb[0].mxu1 %v2482_v31  ;;  %v3017_v28 = vld [vmem:[%s3501_s7 + $0x14] sm:$0xf] }
  0x25   :  { %2304 = vmatpush3.bf16.msra.mxu1 %v2490_v29  ;;  %2299 = vmatprep.mubr.bf16.mxu1 %v2491_v35  ;;  %v3022_v29 = vld [vmem:[%s3501_s7 + $0x18] sm:$0xff] }
  0x26   :  { %2305 = vmatprep.subr.bf16.mxu1 %v2495_v34 }
  0x27   :  { %768 = vmatpush1.bf16.msra.mxu0 %v2478_v30  ;;  %v3027_v30 = vld [vmem:[%s3501_s7 + $0x20] sm:$0xf] }
  0x28   :  { %769 = vmatprep.subr.bf16.mxu0 %v2485_v32  ;;  %3534 = vst [vmem:[#allocation18_spill] sm:$0xff] %v3027_v30  ;;  %v3037_v32 = vld [vmem:[%s3501_s7 + $0x2c] sm:$0xf] }
  0x29   :  { %2306 = vmatpush3.bf16.msra.mxu1 %v2495_v34  ;;  %3535 = vst [vmem:[#allocation19_spill] sm:$0xff] %v3037_v32  ;;  %v3047_v34 = vld [vmem:[%s3501_s7 + $0x38] sm:$0xf] }
  0x2a   :  { %341 = vmatmul.mubr.bf16.gmra.mrb[4].mxu0 %v2482_v31  ;;  %2307 = vmatprep.subr.bf16.mxu1 %v2499_v37  ;;  %v3032_v31 = vld [vmem:[%s3501_s7 + $0x24] sm:$0xff]  ;;  %3536 = vst [vmem:[#allocation20_spill] sm:$0xff] %v3047_v34 }
  0x2b   :  { %770 = vmatpush1.bf16.msra.mxu0 %v2483_v33  ;;  %350 = vmatprep.mubr.bf16.mxu0 %v2584_v1  ;;  %v3042_v33 = vld [vmem:[%s3501_s7 + $0x30] sm:$0xff] }
  0x2c   :  { %771 = vmatprep.subr.bf16.mxu0 %v2489_v36  ;;  %2300 = vmatmul.mubr.bf16.gmra.mrb[4].mxu1 %v2500_v40  ;;  %v3057_v36 = vld [vmem:[%s3501_s7 + $0x44] sm:$0xf] }
  0x2d   :  { %2308 = vmatpush3.bf16.msra.mxu1 %v2499_v37  ;;  %2319 = vmatprep.mubr.bf16.mxu1 %v2509_v43  ;;  %3537 = vst [vmem:[#allocation21_spill] sm:$0xff] %v3057_v36  ;;  %v3062_v37 = vld [vmem:[%s3501_s7 + $0x48] sm:$0xff] }
  0x2e   :  { %2309 = vmatprep.subr.bf16.mxu1 %v2504_v41  ;;  %3538 = vst [vmem:[#allocation22_spill] sm:$0xff] %v3062_v37 }
  0x2f   :  { %772 = vmatpush1.bf16.msra.mxu0 %v2487_v38  ;;  %v3067_v38 = vld [vmem:[%s3501_s7 + $0x50] sm:$0xf] }
  0x30   :  { %773 = vmatprep.subr.bf16.mxu0 %v2494_v39  ;;  %3539 = vst [vmem:[#allocation23_spill] sm:$0xff] %v3067_v38  ;;  %v3072_v39 = vld [vmem:[%s3501_s7 + $0x54] sm:$0xff] }
  0x31   :  { %2310 = vmatpush3.bf16.msra.mxu1 %v2504_v41  ;;  %3540 = vst [vmem:[#allocation24_spill] sm:$0xff] %v3072_v39  ;;  %v3082_v41 = vld [vmem:[%s3501_s7 + $0x60] sm:$0xff] }
  0x32   :  { %351 = vmatmul.mubr.bf16.gmra.mrb[8].mxu0 %v2491_v35  ;;  %2311 = vmatprep.subr.bf16.mxu1 %v2508_v45  ;;  %v3052_v35 = vld [vmem:[%s3501_s7 + $0x3c] sm:$0xff]  ;;  %3542 = vst [vmem:[#allocation26_spill] sm:$0xff] %v3082_v41 }
  0x33   :  { %774 = vmatpush1.bf16.msra.mxu0 %v2492_v42  ;;  %360 = vmatprep.mubr.bf16.mxu0 %v2584_v1  ;;  %v3087_v42 = vld [vmem:[%s3501_s7 + $0x68] sm:$0xf] }
  0x34   :  { %775 = vmatprep.subr.bf16.mxu0 %v2498_v44  ;;  %3543 = vst [vmem:[#allocation27_spill] sm:$0xff] %v3087_v42  ;;  %v3097_v44 = vld [vmem:[%s3501_s7 + $0x74] sm:$0xf] }
  0x35   :  { %2312 = vmatpush3.bf16.msra.mxu1 %v2508_v45  ;;  %3545 = vst [vmem:[#allocation29_spill] sm:$0xff] %v3097_v44  ;;  %v3102_v45 = vld [vmem:[%s3501_s7 + $0x78] sm:$0xff] }
  0x36   :  { %2313 = vmatprep.subr.bf16.mxu1 %v2510_v48  ;;  %3546 = vst [vmem:[#allocation30_spill] sm:$0xff] %v3102_v45 }
  0x37   :  { %776 = vmatpush1.bf16.msra.mxu0 %v2496_v46  ;;  %v3107_v46 = vld [vmem:[%s3501_s7 + $0x80] sm:$0xf] }
  0x38   :  { %777 = vmatprep.subr.bf16.mxu0 %v2503_v47  ;;  %3547 = vst [vmem:[#allocation31_spill] sm:$0xff] %v3107_v46  ;;  %v3112_v47 = vld [vmem:[%s3501_s7 + $0x84] sm:$0xff]  ;;  %v129_v46 = vld [vmem:[%s3504_s4] sm:$0x7] }
  0x39   :  { %2314 = vmatpush3.bf16.msra.mxu1 %v2510_v48  ;;  %3548 = vst [vmem:[#allocation32_spill] sm:$0xff] %v3112_v47  ;;  %v3117_v48 = vld [vmem:[%s3501_s7 + $0x8c] sm:$0xf] }
  0x3a   :  { %361 = vmatmul.mubr.bf16.gmra.mrb[12].mxu0 %v2500_v40  ;;  %2315 = vmatprep.subr.bf16.mxu1 %v2511_v51  ;;  %v3077_v40 = vld [vmem:[%s3501_s7 + $0x5c] sm:$0xf]  ;;  %3549 = vst [vmem:[#allocation33_spill] sm:$0xff] %v3117_v48 }
  0x3b   :  { %778 = vmatpush1.bf16.msra.mxu0 %v2501_v49  ;;  %797 = vmatprep.mubr.bf16.mxu0 %v2584_v1  ;;  %3541 = vst [vmem:[#allocation25_spill] sm:$0xff] %v3077_v40  ;;  %v3122_v49 = vld [vmem:[%s3501_s7 + $0x90] sm:$0xff] }
  0x3c   :  { %779 = vmatprep.subr.bf16.mxu0 %v2507_v50  ;;  %3550 = vst [vmem:[#allocation34_spill] sm:$0xff] %v3122_v49  ;;  %v3127_v50 = vld [vmem:[%s3501_s7 + $0x98] sm:$0xf] }
  0x3d   :  { %2316 = vmatpush3.bf16.msra.mxu1 %v2511_v51  ;;  %3551 = vst [vmem:[#allocation35_spill] sm:$0xff] %v3127_v50  ;;  %v3132_v51 = vld [vmem:[%s3501_s7 + $0x9c] sm:$0xff] }
  0x3e   :  { %2317 = vmatprep.subr.bf16.mxu1 %v2513_v53  ;;  %3552 = vst [vmem:[#allocation36_spill] sm:$0xff] %v3132_v51  ;;  %v3162_v50 = vld [vmem:[%s3502_s5] ss:$0 sm:$0xff] }
  0x3f   :  { %780 = vmatpush1.bf16.msra.mxu0 %v2505_v52  ;;  %v3137_v52 = vld [vmem:[%s3501_s7 + $0xa4] sm:$0xf]  ;;  %3558 = vst [vmem:[#allocation42_spill] sm:$0xff] %v3162_v50 }
  0x40   :  { %3553 = vst [vmem:[#allocation37_spill] sm:$0xff] %v3137_v52  ;;  %v3167_v52 = vld [vmem:[%s3503_s9] ss:$0 sm:$0xff] }
  0x41   :  { %2318 = vmatpush3.bf16.msra.mxu1 %v2513_v53  ;;  %v3142_v53 = vld [vmem:[%s3501_s7 + $0xa8] sm:$0xff]  ;;  %3559 = vst [vmem:[#allocation43_spill] sm:$0xff] %v3167_v52 }
  0x42   :  { %798 = vmatmul.mubr.bf16.vlgmr.msra.gmra.mrb[16].mxu0 %v2509_v43  ;;  %v3092_v43 = vld [vmem:[%s3501_s7 + $0x6c] sm:$0xff]  ;;  %3554 = vst [vmem:[#allocation38_spill] sm:$0xff] %v3142_v53 }
  0x43   :  { %807 = vmatprep.mubr.bf16.mxu0 %v2584_v1  ;;  %3544 = vst [vmem:[#allocation28_spill] sm:$0xff] %v3092_v43 }
  0x44   :  { %2320 = vmatmul.mubr.bf16.vlgmr.msra.gmra.mrb[8].mxu1 %v2512_v54 }
  0x45   :  { %2323 = vmatprep.mubr.bf16.mxu1 %v2514_v55 }
  0x4a   :  { %808 = vmatmul.mubr.bf16.gmra.mrb[20].mxu0 %v2512_v54  ;;  %v3147_v54 = vld [vmem:[%s3501_s7 + $0xb0] sm:$0xf] }
  0x4b   :  { %817 = vmatprep.mubr.bf16.mxu0 %v2584_v1  ;;  %3555 = vst [vmem:[#allocation39_spill] sm:$0xff] %v3147_v54  ;;  %v131_v54 = vlaneseq }
  0x4c   :  { %2324 = vmatmul.mubr.bf16.gmra.mrb[12].mxu1 %v2515_v56 }
  0x4d   :  { %v3169_v53 = vshrl.u32 %v131_v54, 7 }
  0x4f   :  { %v3518_v52 = vsub.s32 2, %v3169_v53 }
  0x52   :  { %818 = vmatmul.mubr.bf16.gmra.mrb[24].mxu0 %v2514_v55  ;;  %v3152_v55 = vld [vmem:[%s3501_s7 + $0xb4] sm:$0xff] }
  0x53   :  { %827 = vmatprep.mubr.bf16.mxu0 %v2584_v1  ;;  %v2882_v1 = vld [vmem:[%s3500_s3 + $0x30] sm:$0xff]  ;;  %3556 = vst [vmem:[#allocation40_spill] sm:$0xff] %v3152_v55  ;;  %v3512_v55 = vsub.s32 0, %v3169_v53 }
  0x54   :  { %3525 = vst [vmem:[#allocation9_spill] sm:$0xff] %v2882_v1 }
  0x55   :  { %v3178_v48 = vrot.slane %v129_v46, %v3512_v55  ;;  %v142_v55 = vrot.slane %v129_v46, %v3518_v52 }
  0x5a   :  { %828 = vmatmul.mubr.bf16.gmra.mrb[28].mxu0 %v2515_v56  ;;  %v3157_v56 = vld [vmem:[%s3501_s7 + $0xbc] sm:$0xf]  ;;  %s3236_s7 = smov 0  }
  0x5b   :  { %3557 = vst [vmem:[#allocation41_spill] sm:$0xff] %v3157_v56  ;;  %v3513_v56 = vsub.s32 1, %v3169_v53 }
  0x5d   :  { %v3182_v50 = vrot.slane %v129_v46, %v3513_v56 }
  0xf5   :  { %v332_v54 = vpop.f32.mrb[0].mxu0 }
  0xf6   :  { %v333_v49 = vadd.f32 %v332_v54, %v3178_v48  ;;  %v334_v51 = vpop.f32.mrb[1].mxu0 }
  0xf7   :  { %v335_v42 = vadd.f32 %v334_v51, %v3182_v50  ;;  %v336_v44 = vpop.f32.mrb[2].mxu0  ;;  %v2297_v41 = vpop.f32.mrb[0].mxu1 }
  0xf8   :  { %v337_v45 = vadd.f32 %v336_v44, %v3178_v48  ;;  %v338_v47 = vpop.f32.mrb[3].mxu0  ;;  %v414_v43 = vadd.f32 %v2297_v41, %v142_v55  ;;  %v405_v34 = vpop.f32.mrb[1].mxu1 }
  0xf9   :  { %v2179_v38 = vpack.c.bf16 %v335_v42, %v333_v49  ;;  %v339_v40 = vadd.f32 %v338_v47, %v3182_v50  ;;  %v406_v36 = vadd.f32 %v405_v34, %v142_v55  ;;  %v2298_v37 = vpop.f32.mrb[2].mxu1 }
  0xfa   :  { %v2184_v44 = vpack.c.bf16 %v414_v43, %v414_v43  ;;  %v417_v30 = vadd.f32 %v2298_v37, %v142_v55  ;;  %v408_v32 = vpop.f32.mrb[3].mxu1 }
  0xfb   :  { %540 = vst [vmem:[#allocation2] sm:$0xff] %v2179_v38  ;;  %v2181_v56 = vpack.c.bf16 %v339_v40, %v337_v45  ;;  %v2180_v49 = vpack.c.bf16 %v406_v36, %v406_v36  ;;  %v409_v47 = vadd.f32 %v408_v32, %v142_v55 }
  0xfc   :  { %545 = vst [vmem:[#allocation2 + $0x20] sm:$0xf] %v2184_v44  ;;  %v2186_v41 = vpack.c.bf16 %v417_v30, %v417_v30 }
  0xfd   :  { %542 = vst [vmem:[#allocation2 + $0xc] sm:$0xff] %v2181_v56  ;;  %v342_v54 = vpop.f32.mrb[4].mxu0  ;;  %541 = vst [vmem:[#allocation2 + $0x8] sm:$0xf] %v2180_v49  ;;  %v2182_v56 = vpack.c.bf16 %v409_v47, %v409_v47 }
  0xfe   :  { %v343_v51 = vadd.f32 %v342_v54, %v3178_v48  ;;  %v344_v39 = vpop.f32.mrb[5].mxu0  ;;  %547 = vst [vmem:[#allocation2 + $0x2c] sm:$0xf] %v2186_v41 }
  0xff   :  { %v345_v46 = vadd.f32 %v344_v39, %v3182_v50  ;;  %v346_v42 = vpop.f32.mrb[6].mxu0  ;;  %543 = vst [vmem:[#allocation2 + $0x14] sm:$0xf] %v2182_v56  ;;  %v2301_v37 = vpop.f32.mrb[4].mxu1 }
 0x100   :  { %v347_v38 = vadd.f32 %v346_v42, %v3178_v48  ;;  %v348_v40 = vpop.f32.mrb[7].mxu0  ;;  %v430_v54 = vadd.f32 %v2301_v37, %v142_v55  ;;  %v421_v39 = vpop.f32.mrb[5].mxu1 }
 0x101   :  { %v2183_v45 = vpack.c.bf16 %v345_v46, %v343_v51  ;;  %v349_v34 = vadd.f32 %v348_v40, %v3182_v50  ;;  %v422_v32 = vadd.f32 %v421_v39, %v142_v55  ;;  %v2302_v52 = vpop.f32.mrb[6].mxu1 }
 0x102   :  { %v2192_v30 = vpack.c.bf16 %v430_v54, %v430_v54  ;;  %v433_v51 = vadd.f32 %v2302_v52, %v142_v55  ;;  %v424_v46 = vpop.f32.mrb[7].mxu1 }
 0x103   :  { %544 = vst [vmem:[#allocation2 + $0x18] sm:$0xff] %v2183_v45  ;;  %v2185_v43 = vpack.c.bf16 %v349_v34, %v347_v38  ;;  %v2188_v40 = vpack.c.bf16 %v422_v32, %v422_v32  ;;  %v425_v41 = vadd.f32 %v424_v46, %v142_v55 }
 0x104   :  { %553 = vst [vmem:[#allocation2 + $0x50] sm:$0xf] %v2192_v30  ;;  %v2194_v34 = vpack.c.bf16 %v433_v51, %v433_v51 }
 0x105   :  { %546 = vst [vmem:[#allocation2 + $0x24] sm:$0xff] %v2185_v43  ;;  %v352_v36 = vpop.f32.mrb[8].mxu0  ;;  %549 = vst [vmem:[#allocation2 + $0x38] sm:$0xf] %v2188_v40  ;;  %v2190_v37 = vpack.c.bf16 %v425_v41, %v425_v41  ;;  %v3561_v41 = vsub.s32 1, %v3169_v53 }
 0x106   :  { %v353_v42 = vadd.f32 %v352_v36, %v3178_v48  ;;  %v354_v44 = vpop.f32.mrb[9].mxu0  ;;  %555 = vst [vmem:[#allocation2 + $0x5c] sm:$0xf] %v2194_v34 }
 0x107   :  { %v355_v49 = vadd.f32 %v354_v44, %v3182_v50  ;;  %v356_v47 = vpop.f32.mrb[10].mxu0  ;;  %551 = vst [vmem:[#allocation2 + $0x44] sm:$0xf] %v2190_v37 }
 0x108   :  { %v357_v38 = vadd.f32 %v356_v47, %v3178_v48  ;;  %v358_v45 = vpop.f32.mrb[11].mxu0 }
 0x109   :  { %v2187_v56 = vpack.c.bf16 %v355_v49, %v353_v42  ;;  %v359_v43 = vadd.f32 %v358_v45, %v3182_v50  ;;  %v596_v42 = vld [vmem:[%s3505_s8] sm:$0x7]  ;;  %v3560_v49 = vsub.s32 0, %v3169_v53 }
 0x10b   :  { %548 = vst [vmem:[#allocation2 + $0x30] sm:$0xff] %v2187_v56  ;;  %v2189_v54 = vpack.c.bf16 %v359_v43, %v357_v38  ;;  %v3208_v47 = vrot.slane %v596_v42, %v3560_v49  ;;  %v3212_v38 = vrot.slane %v596_v42, %v3561_v41 }
 0x10d   :  { %550 = vst [vmem:[#allocation2 + $0x3c] sm:$0xff] %v2189_v54  ;;  %v362_v52 = vpop.f32.mrb[12].mxu0  ;;  %v3562_v54 = vsub.s32 2, %v3169_v53 }
 0x10e   :  { %v363_v39 = vadd.f32 %v362_v52, %v3178_v48  ;;  %v364_v36 = vpop.f32.mrb[13].mxu0 }
 0x10f   :  { %v365_v55 = vadd.f32 %v364_v36, %v3182_v50  ;;  %v366_v32 = vpop.f32.mrb[14].mxu0  ;;  %v609_v52 = vrot.slane %v596_v42, %v3562_v54 }
 0x110   :  { %v367_v44 = vadd.f32 %v366_v32, %v3178_v48  ;;  %v368_v30 = vpop.f32.mrb[15].mxu0 }
 0x111   :  { %v2191_v51 = vpack.c.bf16 %v365_v55, %v363_v39  ;;  %v369_v46 = vadd.f32 %v368_v30, %v3182_v50 }
 0x113   :  { %552 = vst [vmem:[#allocation2 + $0x48] sm:$0xff] %v2191_v51  ;;  %v2193_v40 = vpack.c.bf16 %v369_v46, %v367_v44 }
 0x115   :  { %554 = vst [vmem:[#allocation2 + $0x54] sm:$0xff] %v2193_v40  ;;  %v799_v45 = vpop.f32.mrb[16].mxu0 }
 0x116   :  { %v800_v34 = vadd.f32 %v799_v45, %v3208_v47  ;;  %v801_v56 = vpop.f32.mrb[17].mxu0 }
 0x117   :  { %v802_v48 = vadd.f32 %v801_v56, %v3212_v38  ;;  %v803_v43 = vpop.f32.mrb[18].mxu0  ;;  %v2321_v32 = vpop.f32.mrb[8].mxu1 }
 0x118   :  { %v804_v50 = vadd.f32 %v803_v43, %v3208_v47  ;;  %v805_v37 = vpop.f32.mrb[19].mxu0  ;;  %v881_v44 = vadd.f32 %v2321_v32, %v609_v52  ;;  %v872_v30 = vpop.f32.mrb[9].mxu1 }
 0x119   :  { %v2195_v39 = vpack.c.bf16 %v802_v48, %v800_v34  ;;  %v806_v36 = vadd.f32 %v805_v37, %v3212_v38  ;;  %v873_v46 = vadd.f32 %v872_v30, %v609_v52  ;;  %v2322_v49 = vpop.f32.mrb[10].mxu1 }
 0x11a   :  { %v2200_v45 = vpack.c.bf16 %v881_v44, %v881_v44  ;;  %v884_v56 = vadd.f32 %v2322_v49, %v609_v52  ;;  %v875_v43 = vpop.f32.mrb[11].mxu1 }
 0x11b   :  { %1007 = vst [vmem:[#allocation3] sm:$0xff] %v2195_v39  ;;  %v2197_v55 = vpack.c.bf16 %v806_v36, %v804_v50  ;;  %v2196_v34 = vpack.c.bf16 %v873_v46, %v873_v46  ;;  %v876_v48 = vadd.f32 %v875_v43, %v609_v52 }
 0x11c   :  { %1012 = vst [vmem:[#allocation3 + $0x20] sm:$0xf] %v2200_v45  ;;  %v2202_v54 = vpack.c.bf16 %v884_v56, %v884_v56 }
 0x11d   :  { %1009 = vst [vmem:[#allocation3 + $0xc] sm:$0xff] %v2197_v55  ;;  %v809_v51 = vpop.f32.mrb[20].mxu0  ;;  %1008 = vst [vmem:[#allocation3 + $0x8] sm:$0xf] %v2196_v34  ;;  %v2198_v55 = vpack.c.bf16 %v876_v48, %v876_v48 }
 0x11e   :  { %v810_v40 = vadd.f32 %v809_v51, %v3208_v47  ;;  %v811_v41 = vpop.f32.mrb[21].mxu0  ;;  %1014 = vst [vmem:[#allocation3 + $0x2c] sm:$0xf] %v2202_v54 }
 0x11f   :  { %v812_v53 = vadd.f32 %v811_v41, %v3212_v38  ;;  %v813_v42 = vpop.f32.mrb[22].mxu0  ;;  %1010 = vst [vmem:[#allocation3 + $0x14] sm:$0xf] %v2198_v55  ;;  %v2325_v44 = vpop.f32.mrb[12].mxu1 }
 0x120   :  { %v814_v50 = vadd.f32 %v813_v42, %v3208_v47  ;;  %v815_v37 = vpop.f32.mrb[23].mxu0  ;;  %v897_v30 = vadd.f32 %v2325_v44, %v609_v52  ;;  %v888_v51 = vpop.f32.mrb[13].mxu1 }
 0x121   :  { %v2199_v39 = vpack.c.bf16 %v812_v53, %v810_v40  ;;  %v816_v36 = vadd.f32 %v815_v37, %v3212_v38  ;;  %v889_v49 = vadd.f32 %v888_v51, %v609_v52  ;;  %v2326_v41 = vpop.f32.mrb[14].mxu1 }
 0x122   :  { %v2208_v56 = vpack.c.bf16 %v897_v30, %v897_v30  ;;  %v900_v40 = vadd.f32 %v2326_v41, %v609_v52  ;;  %v891_v53 = vpop.f32.mrb[15].mxu1 }
 0x123   :  { %1011 = vst [vmem:[#allocation3 + $0x18] sm:$0xff] %v2199_v39  ;;  %v2201_v32 = vpack.c.bf16 %v816_v36, %v814_v50  ;;  %v2204_v48 = vpack.c.bf16 %v889_v49, %v889_v49  ;;  %v892_v37 = vadd.f32 %v891_v53, %v609_v52  ;;  %v3232_v53 = vmov 0.0  }
 0x124   :  { %1020 = vst [vmem:[#allocation3 + $0x50] sm:$0xf] %v2208_v56  ;;  %v2210_v39 = vpack.c.bf16 %v900_v40, %v900_v40 }
 0x125   :  { %1013 = vst [vmem:[#allocation3 + $0x24] sm:$0xff] %v2201_v32  ;;  %v819_v46 = vpop.f32.mrb[24].mxu0  ;;  %1016 = vst [vmem:[#allocation3 + $0x38] sm:$0xf] %v2204_v48  ;;  %v2206_v32 = vpack.c.bf16 %v892_v37, %v892_v37 }
 0x126   :  { %v820_v43 = vadd.f32 %v819_v46, %v3208_v47  ;;  %v821_v45 = vpop.f32.mrb[25].mxu0  ;;  %1022 = vst [vmem:[#allocation3 + $0x5c] sm:$0xf] %v2210_v39 }
 0x127   :  { %v822_v42 = vadd.f32 %v821_v45, %v3212_v38  ;;  %v823_v34 = vpop.f32.mrb[26].mxu0  ;;  %1018 = vst [vmem:[#allocation3 + $0x44] sm:$0xf] %v2206_v32 }
 0x128   :  { %v824_v50 = vadd.f32 %v823_v34, %v3208_v47  ;;  %v825_v54 = vpop.f32.mrb[27].mxu0 }
 0x129   :  { %v2203_v36 = vpack.c.bf16 %v822_v42, %v820_v43  ;;  %v826_v55 = vadd.f32 %v825_v54, %v3212_v38  ;;  %v3234_v42 = vmov 0.0  }
 0x12b   :  { %1015 = vst [vmem:[#allocation3 + $0x30] sm:$0xff] %v2203_v36  ;;  %v2205_v44 = vpack.c.bf16 %v826_v55, %v824_v50 }
 0x12d   :  { %1017 = vst [vmem:[#allocation3 + $0x3c] sm:$0xff] %v2205_v44  ;;  %v829_v30 = vpop.f32.mrb[28].mxu0 }
 0x12e   :  { %v830_v51 = vadd.f32 %v829_v30, %v3208_v47  ;;  %v831_v46 = vpop.f32.mrb[29].mxu0 }
 0x12f   :  { %v832_v52 = vadd.f32 %v831_v46, %v3212_v38  ;;  %v833_v49 = vpop.f32.mrb[30].mxu0 }
 0x130   :  { %v834_v41 = vadd.f32 %v833_v49, %v3208_v47  ;;  %v835_v45 = vpop.f32.mrb[31].mxu0 }
 0x131   :  { %v2207_v43 = vpack.c.bf16 %v832_v52, %v830_v51  ;;  %v836_v56 = vadd.f32 %v835_v45, %v3212_v38 }
 0x133   :  { %1019 = vst [vmem:[#allocation3 + $0x48] sm:$0xff] %v2207_v43  ;;  %v2209_v40 = vpack.c.bf16 %v836_v56, %v834_v41 }
 0x135   :  { %1021 = vst [vmem:[#allocation3 + $0x54] sm:$0xff] %v2209_v40 }
 0x136 LB: > { %v3563_v9 = vld [vmem:[#allocation17_spill] sm:$0xff]  ;;  %v3564_v7 = vld [vmem:[#allocation15_spill] sm:$0xff]  ;;  %v2098_v47 = vcombine.high %v2842_v57, %v2852_v59  ;;  %v2097_v38 = vcombine.low %v2842_v57, %v2852_v59  ;;  %v2101_v34 = vcombine.high %v2862_v61, %v2872_v63  ;;  %v2100_v48 = vcombine.low %v2862_v61, %v2872_v63  ;;  %v3568_v0 = vld [vmem:[#allocation8_spill] sm:$0xff]  ;;  %s2211_s8 = smul.u32 12, %s2582_s7  ;;  %s1099_s16 = ssub.s32 7, %s2582_s7  ;;  %v2578_v42 = vphi %v3234_v42, %v1348_v42   ;;  %v2574_v53 = vphi %v3232_v53, %v1597_v53   ;;  %s2582_s7 = sphi %s3236_s7, %s1096_s7  }
 0x137   : > { %v3565_v5 = vld [vmem:[#allocation13_spill] sm:$0xff]  ;;  %v3566_v3 = vld [vmem:[#allocation11_spill] sm:$0xff]  ;;  %v2099_v37 = vcombine.low %v2847_v58, %v2857_v60  ;;  %v2585_v54 = vmov 0.0   ;;  %v2102_v39 = vcombine.low %v2867_v62, %v3568_v0  ;;  %v2586_v36 = vmov 0   ;;  %v3569_v4 = vld [vmem:[#allocation12_spill] sm:$0xff]  ;;  %s3371_s3 = smul.u32 12, %s1099_s16 }
 0x138   : > { %v3567_v1 = vld [vmem:[#allocation9_spill] sm:$0xff]  ;;  %1234 = vmatprep.subr.bf16.mxu0 %v2098_v47  ;;  %2327 = vmatprep.subr.bf16.mxu1 %v2585_v54  ;;  %v2107_v32 = vcombine.high %v3565_v5, %v3564_v7  ;;  %v3570_v2 = vld [vmem:[#allocation10_spill] sm:$0xff]  ;;  %v2106_v30 = vcombine.low %v3565_v5, %v3564_v7  ;;  %vm2587_vm0 = vmmov 0   ;;  %v2110_v51 = vcombine.high %v3563_v9, %v2932_v11  ;;  %v3571_v8 = vld [vmem:[#allocation16_spill] sm:$0xff]  ;;  %s1102_s9 = scalar_lea.vmem [#allocation2], %s2211_s8  ;;  %s2152_s18 = sshll.u32 %s2582_s7, 2 }
 0x139   : > { %1235 = vmatpush1.bf16.msra.mxu0 %v2097_v38  ;;  %v2104_v50 = vcombine.high %v3567_v1, %v3566_v3  ;;  %2328 = vmatpush3.bf16.msra.mxu1 %v2099_v37  ;;  %v2103_v55 = vcombine.low %v3567_v1, %v3566_v3  ;;  %v2105_v44 = vcombine.low %v3570_v2, %v3569_v4  ;;  %v3572_v6 = vld [vmem:[#allocation14_spill] sm:$0xff]  ;;  %s1351_s17 = scalar_lea.vmem [#allocation3], %s3371_s3  ;;  %s1600_s0 = scalar_lea.vmem [#allocation4], %s2152_s18 }
 0x13a   : > { %1236 = vmatprep.subr.bf16.mxu0 %v2101_v34  ;;  %1266 = vmatprep.mubr.bf16.mxu0 %v2586_v36  ;;  %v2108_v46 = vcombine.low %v3572_v6, %v3571_v8  ;;  %v2109_v52 = vcombine.low %v3563_v9, %v2932_v11  ;;  %v2113_v49 = vcombine.high %v2942_v13, %v2952_v15  ;;  %s2153_s19 = sshll.u32 %s1099_s16, 2  ;;  %s1096_s7 = sadd.s32 1, %s2582_s7  }
 0x13b   : > { %2329 = vmatprep.subr.bf16.mxu1 %v2585_v54  ;;  %2343 = vmatprep.mubr.msk.bf16.mxu1 %vm2587_vm0, %v2585_v54  ;;  %v2111_v41 = vcombine.low %v2927_v10, %v2937_v12  ;;  %v2112_v45 = vcombine.low %v2942_v13, %v2952_v15  ;;  %v2116_v43 = vcombine.high %v2962_v17, %v2972_v19  ;;  %s1604_s20 = scalar_lea.vmem [#allocation5], %s2153_s19  ;;  %p1093_p0 = scmp.ge.s32.totalorder %s1096_s7, 8  }
 0x13c   : > { %v2114_v56 = vcombine.low %v2947_v14, %v2957_v16  ;;  %v2115_v40 = vcombine.low %v2962_v17, %v2972_v19  ;;  %v2119_v47 = vcombine.high %v2982_v21, %v2992_v23  ;;  %v2117_v38 = vcombine.low %v2967_v18, %v2977_v20  ;;  %v2540_v57 = vld [vmem:[%s3492_s10 + $0x10] sm:$0xff] (%p1093_p0)   ;;  %v2542_v59 = vld [vmem:[%s3492_s10 + $0x18] sm:$0xff] (%p1093_p0)   ;;  %v2544_v61 = vld [vmem:[%s3492_s10 + $0x20] sm:$0xff] (%p1093_p0)  }
 0x13d   : > { %1237 = vmatpush1.bf16.msra.mxu0 %v2100_v48  ;;  %2330 = vmatpush3.bf16.msra.mxu1 %v2102_v39  ;;  %v2118_v34 = vcombine.low %v2982_v21, %v2992_v23  ;;  %v2126_v48 = vcombine.high %v3002_v25, %v3012_v27  ;;  %v2120_v37 = vcombine.low %v2987_v22, %v2997_v24  ;;  %v2541_v58 = vld [vmem:[%s3493_s11 + $0x10] sm:$0xff] (%p1093_p0)   ;;  %v2543_v60 = vld [vmem:[%s3493_s11 + $0x18] sm:$0xff] (%p1093_p0)   ;;  %v2545_v62 = vld [vmem:[%s3493_s11 + $0x20] sm:$0xff] (%p1093_p0)  }
 0x13e   : > { %1238 = vmatprep.subr.bf16.mxu0 %v2104_v50  ;;  %2331 = vmatprep.subr.bf16.mxu1 %v2585_v54  ;;  %v1105_v50 = vpack.c.bf16 %v2578_v42, %v2578_v42  ;;  %v2125_v39 = vcombine.low %v3002_v25, %v3012_v27  ;;  %v2546_v63 = vld [vmem:[%s3492_s10 + $0x28] sm:$0xff] (%p1093_p0)   ;;  %v2548_v13 = vld [vmem:[%s3492_s10 + $0x30] sm:$0xff] (%p1093_p0)   ;;  %v2550_v15 = vld [vmem:[%s3492_s10 + $0x38] sm:$0xff] (%p1093_p0)  }
 0x13f   :  { %v2547_v10 = vld [vmem:[%s3493_s11 + $0x28] sm:$0xff] (%p1093_p0)   ;;  %v2549_v14 = vld [vmem:[%s3493_s11 + $0x30] sm:$0xff] (%p1093_p0)   ;;  %v2551_v16 = vld [vmem:[%s3493_s11 + $0x38] sm:$0xff] (%p1093_p0)  }
 0x140   :  { %v2154_v23 = vld [vmem:[%s3494_s12] ss:$0 sm:$0xff] (%p1093_p0) }
 0x141   : > { %1239 = vmatpush1.bf16.msra.mxu0 %v2103_v55  ;;  %2332 = vmatpush3.bf16.msra.mxu1 %v2105_v44  ;;  %v2129_v55 = vcombine.high %v3022_v29, %v3032_v31  ;;  %v2128_v44 = vcombine.low %v3022_v29, %v3032_v31 }
 0x142   : > { %1240 = vmatprep.subr.bf16.mxu0 %v2107_v32  ;;  %2333 = vmatprep.subr.bf16.mxu1 %v2585_v54  ;;  %v2127_v32 = vcombine.low %v3007_v26, %v3017_v28 }
 0x145   : > { %1241 = vmatpush1.bf16.msra.mxu0 %v2106_v30  ;;  %2334 = vmatpush3.bf16.msra.mxu1 %v2108_v46  ;;  %v2132_v30 = vcombine.high %v3042_v33, %v3052_v35  ;;  %v3574_v46 = vld [vmem:[#allocation18_spill] sm:$0xff] }
 0x146   : > { %1242 = vmatprep.subr.bf16.mxu0 %v2110_v51  ;;  %2335 = vmatprep.subr.bf16.mxu1 %v2585_v54  ;;  %v3573_v51 = vld [vmem:[#allocation19_spill] sm:$0xff] }
 0x149   : > { %1243 = vmatpush1.bf16.msra.mxu0 %v2109_v52  ;;  %2336 = vmatpush3.bf16.msra.mxu1 %v2111_v41  ;;  %v2130_v52 = vcombine.low %v3574_v46, %v3573_v51  ;;  %v3576_v41 = vld [vmem:[#allocation22_spill] sm:$0xff]  ;;  %v3585_v51 = vld [vmem:[#allocation29_spill] sm:$0xff]  ;;  %v3586_v46 = vld [vmem:[#allocation27_spill] sm:$0xff] }
 0x14a   : > { %1244 = vmatprep.subr.bf16.mxu0 %v2113_v49  ;;  %2337 = vmatprep.subr.bf16.mxu1 %v2585_v54  ;;  %v2131_v49 = vcombine.low %v3042_v33, %v3052_v35 }
 0x14d   : > { %1245 = vmatpush1.bf16.msra.mxu0 %v2112_v45  ;;  %2338 = vmatpush3.bf16.msra.mxu1 %v2114_v56  ;;  %v3578_v56 = vld [vmem:[#allocation20_spill] sm:$0xff] }
 0x14e   : > { %1246 = vmatprep.subr.bf16.mxu0 %v2116_v43  ;;  %2339 = vmatprep.subr.bf16.mxu1 %v2585_v54  ;;  %v3577_v43 = vld [vmem:[#allocation21_spill] sm:$0xff] }
 0x151   : > { %1247 = vmatpush1.bf16.msra.mxu0 %v2115_v40  ;;  %2340 = vmatpush3.bf16.msra.mxu1 %v2117_v38  ;;  %v2133_v40 = vcombine.low %v3578_v56, %v3577_v43  ;;  %v3579_v38 = vld [vmem:[#allocation28_spill] sm:$0xff]  ;;  %v3588_v43 = vld [vmem:[#allocation34_spill] sm:$0xff] }
 0x152   : > { %1248 = vmatprep.subr.bf16.mxu0 %v2119_v47  ;;  %2341 = vmatprep.subr.bf16.mxu1 %v2585_v54 }
 0x155   : > { %1249 = vmatpush1.bf16.msra.mxu0 %v2118_v34  ;;  %2342 = vmatpush3.bf16.msra.mxu1 %v2120_v37  ;;  %v3580_v34 = vld [vmem:[#allocation26_spill] sm:$0xff]  ;;  %v3581_v37 = vld [vmem:[#allocation25_spill] sm:$0xff] }
 0x156   : > { %1483 = vmatprep.subr.bf16.mxu0 %v2126_v48  ;;  %2347 = vmatprep.subr.bf16.mxu1 %v2585_v54  ;;  %v2138_v48 = vcombine.high %v3580_v34, %v3579_v38 }
 0x158   : > { %1267 = vmatmul.mubr.bf16.vlgmr.msra.gmra.mrb[0].mxu0 %v1105_v50  ;;  %2344 = vmatmul.mubr.bf16.vlgmr.msra.gmra.mrb[0].mxu1 %v1105_v50  ;;  %v3582_v50 = vld [vmem:[#allocation23_spill] sm:$0xff] }
 0x159   : > { %1484 = vmatpush1.bf16.msra.mxu0 %v2125_v39  ;;  %1515 = vmatprep.mubr.bf16.mxu0 %v2586_v36  ;;  %v3575_v36 = vld [vmem:[#allocation24_spill] sm:$0xff]  ;;  %v2136_v39 = vcombine.low %v3582_v50, %v3581_v37 }
 0x15a   : > { %1485 = vmatprep.subr.bf16.mxu0 %v2129_v55  ;;  %2348 = vmatpush3.bf16.msra.mxu1 %v2127_v32  ;;  %v2135_v45 = vcombine.high %v3576_v41, %v3575_v36  ;;  %v2134_v47 = vcombine.low %v3576_v41, %v3575_v36  ;;  %v2137_v55 = vcombine.low %v3580_v34, %v3579_v38  ;;  %v3583_v32 = vld [vmem:[#allocation32_spill] sm:$0xff] }
 0x15b   : > { %2363 = vmatprep.mubr.msk.bf16.mxu1 %vm2587_vm0, %v2585_v54  ;;  %2349 = vmatprep.subr.bf16.mxu1 %v2585_v54  ;;  %v3591_v50 = vld [vmem:[#allocation40_spill] sm:$0xff] }
 0x15d   : > { %1486 = vmatpush1.bf16.msra.mxu0 %v2128_v44  ;;  %v3584_v44 = vld [vmem:[#allocation30_spill] sm:$0xff] }
 0x15e   : > { %1487 = vmatprep.subr.bf16.mxu0 %v2132_v30  ;;  %2350 = vmatpush3.bf16.msra.mxu1 %v2130_v52  ;;  %v2141_v30 = vcombine.high %v3584_v44, %v3583_v32  ;;  %v2139_v52 = vcombine.low %v3586_v46, %v3585_v51  ;;  %v3594_v51 = vld [vmem:[#allocation35_spill] sm:$0xff] }
 0x15f   : > { %2351 = vmatprep.subr.bf16.mxu1 %v2585_v54 }
 0x161   : > { %1488 = vmatpush1.bf16.msra.mxu0 %v2131_v49  ;;  %v2140_v49 = vcombine.low %v3584_v44, %v3583_v32 }
 0x162   : > { %1489 = vmatprep.subr.bf16.mxu0 %v2135_v45  ;;  %2352 = vmatpush3.bf16.msra.mxu1 %v2133_v40  ;;  %v3587_v45 = vld [vmem:[#allocation36_spill] sm:$0xff]  ;;  %v3589_v40 = vld [vmem:[#allocation33_spill] sm:$0xff] }
 0x163   : > { %2353 = vmatprep.subr.bf16.mxu1 %v2585_v54  ;;  %v2144_v56 = vcombine.high %v3588_v43, %v3587_v45  ;;  %v2143_v37 = vcombine.low %v3588_v43, %v3587_v45 }
 0x165   : > { %1490 = vmatpush1.bf16.msra.mxu0 %v2134_v47  ;;  %v3590_v47 = vld [vmem:[#allocation31_spill] sm:$0xff] }
 0x166   : > { %1491 = vmatprep.subr.bf16.mxu0 %v2138_v48  ;;  %2354 = vmatpush3.bf16.msra.mxu1 %v2136_v39  ;;  %v2142_v48 = vcombine.low %v3590_v47, %v3589_v40  ;;  %v3592_v39 = vld [vmem:[#allocation38_spill] sm:$0xff]  ;;  %v3596_v40 = vld [vmem:[#allocation39_spill] sm:$0xff] }
 0x167   : > { %2355 = vmatprep.subr.bf16.mxu1 %v2585_v54 }
 0x169   : > { %1492 = vmatpush1.bf16.msra.mxu0 %v2137_v55  ;;  %v2147_v55 = vcombine.high %v3592_v39, %v3591_v50 }
 0x16a   : > { %1493 = vmatprep.subr.bf16.mxu0 %v2141_v30  ;;  %2356 = vmatpush3.bf16.msra.mxu1 %v2139_v52  ;;  %v3593_v30 = vld [vmem:[#allocation37_spill] sm:$0xff]  ;;  %v2146_v52 = vcombine.low %v3592_v39, %v3591_v50 }
 0x16b   : > { %2357 = vmatprep.subr.bf16.mxu1 %v2585_v54  ;;  %v2145_v46 = vcombine.low %v3594_v51, %v3593_v30 }
 0x16d   : > { %1494 = vmatpush1.bf16.msra.mxu0 %v2140_v49  ;;  %v3595_v49 = vld [vmem:[#allocation41_spill] sm:$0xff] }
 0x16e   : > { %1495 = vmatprep.subr.bf16.mxu0 %v2144_v56  ;;  %2358 = vmatpush3.bf16.msra.mxu1 %v2142_v48  ;;  %v2148_v47 = vcombine.low %v3596_v40, %v3595_v49  ;;  %v1354_v56 = vpack.c.bf16 %v2574_v53, %v2574_v53  ;;  %v1103_v48 = vld [vmem:[%s1102_s9] sm:$0xff] }
 0x16f   : > { %2359 = vmatprep.subr.bf16.mxu1 %v2585_v54  ;;  %v1315_v30 = vunpack.c.l.bf16 %v1103_v48 }
 0x171   : > { %1496 = vmatpush1.bf16.msra.mxu0 %v2143_v37  ;;  %v1324_v37 = vrot.slane %v1103_v48, 4 }
 0x172   : > { %1497 = vmatprep.subr.bf16.mxu0 %v2147_v55  ;;  %2360 = vmatpush3.bf16.msra.mxu1 %v2145_v46 }
 0x173   : > { %2361 = vmatprep.subr.bf16.mxu1 %v2585_v54  ;;  %v1326_v55 = vunpack.c.l.bf16 %v1324_v37 }
 0x175   : > { %1498 = vmatpush1.bf16.msra.mxu0 %v2146_v52 }
 0x176   : > { %2362 = vmatpush3.bf16.msra.mxu1 %v2148_v47 }
 0x178   : > { %1516 = vmatmul.mubr.bf16.vlgmr.msra.gmra.mrb[4].mxu0 %v1354_v56 }
 0x179   : > { %2364 = vmatmul.mubr.bf16.vlgmr.msra.gmra.mrb[4].mxu1 %v1354_v56 }
 0x22b   : > { %v1268_v51 = vpop.f32.mrb[0].mxu0  ;;  %v1309_v40 = vpop.f32.mrb[0].mxu1 }
 0x22c   : > { %v1316_v46 = vadd.f32 %v1315_v30, %v1268_v51  ;;  %v1270_v0 = vpop.f32.mrb[1].mxu0  ;;  %v2345_v54 = vpop.f32.mrb[1].mxu1  ;;  %v1104_v30 = vld [vmem:[%s1102_s9 + $0x8] sm:$0xf] }
 0x22d   : > { %v1272_v49 = vpop.f32.mrb[2].mxu0  ;;  %v1327_v52 = vadd.f32 %v1326_v55, %v1270_v0  ;;  %v1312_v47 = vpop.f32.mrb[2].mxu1  ;;  %v1352_v0 = vld [vmem:[%s1351_s17] sm:$0xff] }
 0x22e   : > { %v2121_v1 = vmul.f32 -1.442695, %v1316_v46  ;;  %v1273_v2 = vpop.f32.mrb[3].mxu0  ;;  %v2346_v56 = vpop.f32.mrb[3].mxu1 }
 0x22f   : > { %v2122_v3 = vmul.f32 -1.442695, %v1327_v52  ;;  %v3597_v2 = vld [vmem:[#allocation42_spill] sm:$0xff] }
 0x230   : > { %2516 = vpow2.f32 %v2121_v1  ;;  %v1340_v46 = vadd.f32 %v3597_v2, %v1309_v40  ;;  %v1342_v1 = vunpack.c.l.bf16 %v1104_v30 }
 0x231   : > { %2518 = vpow2.f32 %v2122_v3  ;;  %v1573_v3 = vrot.slane %v1352_v0, 4 }
 0x233   : > { %v1575_v47 = vunpack.c.l.bf16 %v1573_v3 }
 0x23a   : > { %v2517_v4 = vpop.eup %2516 }
 0x23b   : > { %v1320_v48 = vadd.f32 1.0, %v2517_v4  ;;  %v2519_v37 = vpop.eup %2518  ;;  %v1564_v4 = vunpack.c.l.bf16 %v1352_v0 }
 0x23c   : > { %v1331_v51 = vadd.f32 1.0, %v2519_v37 }
 0x23d   : > { %2520 = vrcp.f32 %v1320_v48 }
 0x23e   : > { %2522 = vrcp.f32 %v1331_v51 }
 0x247   : > { %v2521_v55 = vpop.eup %2520 }
 0x248   : > { %v1341_v49 = vmul.f32 %v2521_v55, %v1340_v46  ;;  %v2523_v9 = vpop.eup %2522 }
 0x249   : > { %v1345_v46 = vsub.f32 1.0, %v2523_v9 }
 0x24a   : > { %v1343_v54 = vadd.f32 %v1342_v1, %v1341_v49  ;;  %v1347_v1 = vmul.f32 %v2578_v42, %v2523_v9 }
 0x24b   : > { %v1517_v52 = vpop.f32.mrb[4].mxu0 }
 0x24c   : > { %2524 = vtanh.f32 %v1343_v54  ;;  %v1565_v56 = vadd.f32 %v1564_v4, %v1517_v52  ;;  %v1519_v48 = vpop.f32.mrb[5].mxu0  ;;  %v1558_v37 = vpop.f32.mrb[4].mxu1 }
 0x24d   : > { %v1521_v5 = vpop.f32.mrb[6].mxu0  ;;  %v2365_v2 = vpop.f32.mrb[5].mxu1  ;;  %v1576_v7 = vadd.f32 %v1575_v47, %v1519_v48 }
 0x24e   : > { %v2149_v6 = vmul.f32 -1.442695, %v1565_v56  ;;  %v1522_v40 = vpop.f32.mrb[7].mxu0  ;;  %v1561_v8 = vpop.f32.mrb[6].mxu1 }
 0x24f   : > { %v2366_v30 = vpop.f32.mrb[7].mxu1  ;;  %v2150_v51 = vmul.f32 -1.442695, %v1576_v7  ;;  %v1353_v8 = vld [vmem:[%s1351_s17 + $0x8] sm:$0xf]  ;;  %v3598_v7 = vld [vmem:[#allocation43_spill] sm:$0xff] }
 0x250   : > { %2526 = vpow2.f32 %v2149_v6  ;;  %v1589_v54 = vadd.f32 %v3598_v7, %v1558_v37  ;;  %v1591_v52 = vunpack.c.l.bf16 %v1353_v8  ;;  %v2536_v37 = vld [vmem:[%s3492_s10] sm:$0xff] (%p1093_p0)  }
 0x251   : > { %2528 = vpow2.f32 %v2150_v51  ;;  %2367 = vmatprep.subr.bf16.mxu0 (%p1093_p0), %v2536_v37 }
 0x252   :  { %2368 = vmatpush3.bf16.msra.mxu0 (%p1093_p0), %v2536_v37 }
 0x256   : > { %v2525_v0 = vpop.eup %2524 }
 0x257   : > { %v1346_v55 = vmul.f32 %v2525_v0, %v1345_v46  ;;  %v2537_v0 = vld [vmem:[%s3493_s11] sm:$0xff] (%p1093_p0)  }
 0x258   :  { %2391 = vmatprep.subr.bf16.mxu1 (%p1093_p0), %v2537_v0 }
 0x259   : > { %v1348_v42 = vadd.f32 %v1347_v1, %v1346_v55   ;;  %v2538_v1 = vld [vmem:[%s3492_s10 + $0x8] sm:$0xff] (%p1093_p0)   ;;  %2392 = vmatpush3.bf16.msra.mxu1 (%p1093_p0), %v2537_v0 }
 0x25a   : > { %v2527_v5 = vpop.eup %2526  ;;  %2369 = vmatprep.subr.bf16.mxu0 (%p1093_p0), %v2538_v1 }
 0x25b   : > { %v1598_v3 = vpack.c.bf16 %v1348_v42, %v1348_v42  ;;  %v1569_v49 = vadd.f32 1.0, %v2527_v5  ;;  %v2529_v6 = vpop.eup %2528  ;;  %v2539_v42 = vld [vmem:[%s3493_s11 + $0x8] sm:$0xff] (%p1093_p0)   ;;  %2370 = vmatpush3.bf16.msra.mxu0 (%p1093_p0), %v2538_v1 }
 0x25c   : > { %v1580_v4 = vadd.f32 1.0, %v2529_v6  ;;  %2393 = vmatprep.subr.bf16.mxu1 (%p1093_p0), %v2539_v42  ;;  %2371 = vmatprep.subr.bf16.mxu0 (%p1093_p0), %v2540_v57 }
 0x25d   : > { %1601 = vst [vmem:[%s1600_s0] sm:$0xf] %v1598_v3  ;;  %2530 = vrcp.f32 %v1569_v49  ;;  %2394 = vmatpush3.bf16.msra.mxu1 (%p1093_p0), %v2539_v42 }
 0x25e   : > { %2532 = vrcp.f32 %v1580_v4  ;;  %2395 = vmatprep.subr.bf16.mxu1 (%p1093_p0), %v2541_v58 }
 0x25f   :  { %2372 = vmatpush3.bf16.msra.mxu0 (%p1093_p0), %v2540_v57 }
 0x260   :  { %2373 = vmatprep.subr.bf16.mxu0 (%p1093_p0), %v2542_v59 }
 0x261   :  { %2396 = vmatpush3.bf16.msra.mxu1 (%p1093_p0), %v2541_v58 }
 0x262   :  { %2397 = vmatprep.subr.bf16.mxu1 (%p1093_p0), %v2543_v60 }
 0x263   :  { %2374 = vmatpush3.bf16.msra.mxu0 (%p1093_p0), %v2542_v59 }
 0x264   :  { %2375 = vmatprep.subr.bf16.mxu0 (%p1093_p0), %v2544_v61  ;;  %v2552_v11 = vld [vmem:[#allocation4] sm:$0xff] (%p1093_p0)   ;;  %v2554_v17 = vld [vmem:[#allocation4 + $0x8] sm:$0xff] (%p1093_p0)   ;;  %v2556_v19 = vld [vmem:[#allocation4 + $0x10] sm:$0xff] (%p1093_p0)  }
 0x265   :  { %2398 = vmatpush3.bf16.msra.mxu1 (%p1093_p0), %v2543_v60  ;;  %2383 = vmatprep.mubr.bf16.mxu0 (%p1093_p0), %v2552_v11  ;;  %v2558_v21 = vld [vmem:[#allocation4 + $0x18] sm:$0xff] (%p1093_p0)  }
 0x266   :  { %2399 = vmatprep.subr.bf16.mxu1 (%p1093_p0), %v2545_v62 }
 0x267   : > { %v2531_v47 = vpop.eup %2530  ;;  %2376 = vmatpush3.bf16.msra.mxu0 (%p1093_p0), %v2544_v61 }
 0x268   : > { %v1590_v9 = vmul.f32 %v2531_v47, %v1589_v54  ;;  %v2533_v48 = vpop.eup %2532  ;;  %2377 = vmatprep.subr.bf16.mxu0 (%p1093_p0), %v2546_v63 }
 0x269   : > { %v1594_v40 = vsub.f32 1.0, %v2533_v48  ;;  %v1596_v30 = vmul.f32 %v2574_v53, %v2533_v48  ;;  %2400 = vmatpush3.bf16.msra.mxu1 (%p1093_p0), %v2545_v62 }
 0x26a   : > { %v1592_v56 = vadd.f32 %v1591_v52, %v1590_v9  ;;  %2401 = vmatprep.subr.bf16.mxu1 (%p1093_p0), %v2547_v10 }
 0x26b   :  { %2378 = vmatpush3.bf16.msra.mxu0 (%p1093_p0), %v2546_v63 }
 0x26c   : > { %2534 = vtanh.f32 %v1592_v56  ;;  %2379 = vmatprep.subr.bf16.mxu0 (%p1093_p0), %v2548_v13 }
 0x26d   :  { %2402 = vmatpush3.bf16.msra.mxu1 (%p1093_p0), %v2547_v10 }
 0x26e   :  { %2403 = vmatprep.subr.bf16.mxu1 (%p1093_p0), %v2549_v14 }
 0x26f   :  { %2380 = vmatpush3.bf16.msra.mxu0 (%p1093_p0), %v2548_v13 }
 0x270   :  { %2381 = vmatprep.subr.bf16.mxu0 (%p1093_p0), %v2550_v15 }
 0x271   :  { %2404 = vmatpush3.bf16.msra.mxu1 (%p1093_p0), %v2549_v14 }
 0x272   :  { %2405 = vmatprep.subr.bf16.mxu1 (%p1093_p0), %v2551_v16 }
 0x273   :  { %2382 = vmatpush3.bf16.msra.mxu0 (%p1093_p0), %v2550_v15 }
 0x275   :  { %2406 = vmatpush3.bf16.msra.mxu1 (%p1093_p0), %v2551_v16 }
 0x276   : > { %v2535_v2 = vpop.eup %2534  ;;  %2384 = vmatmul.mubr.bf16.vlgmr.msra.gmra.mrb[0].mxu0 (%p1093_p0), %v2554_v17 }
 0x277   : > { %v1595_v51 = vmul.f32 %v2535_v2, %v1594_v40  ;;  %1095 = sbr.rel (!%p1093_p0) target bundleno = 310 (0x136), region = 102  ;;  %2387 = vmatprep.mubr.bf16.mxu0 (%p1093_p0), %v2556_v19 }
 0x279   : > { %v1597_v53 = vadd.f32 %v1596_v30, %v1595_v51  }
 0x27b   : > { %v1602_v46 = vpack.c.bf16 %v1597_v53, %v1597_v53 }
 0x27d   : > { %1605 = vst [vmem:[%s1604_s20] sm:$0xf] %v1602_v46 }
 0x27e   :  { %2388 = vmatmul.mubr.bf16.gmra.mrb[4].mxu0 %v2558_v21 }
 0x284   :  { %v2553_v12 = vld [vmem:[#allocation5] sm:$0xff]   ;;  %v2555_v18 = vld [vmem:[#allocation5 + $0x8] sm:$0xff]   ;;  %v2557_v20 = vld [vmem:[#allocation5 + $0x10] sm:$0xff]  }
 0x285   :  { %2407 = vmatprep.mubr.bf16.mxu1 %v2553_v12  ;;  %v2559_v22 = vld [vmem:[#allocation5 + $0x18] sm:$0xff]  }
 0x286   :  { %2408 = vmatmul.mubr.bf16.vlgmr.msra.gmra.mrb[0].mxu1 %v2555_v18 }
 0x287   :  { %2411 = vmatprep.mubr.bf16.mxu1 %v2557_v20 }
 0x28e   :  { %2412 = vmatmul.mubr.bf16.gmra.mrb[4].mxu1 %v2559_v22 }
 0x349   :  { %v2385_v24 = vpop.f32.mrb[0].mxu0 }
 0x34a   :  { %v1754_v25 = vadd.f32 %v2385_v24, %v2154_v23  ;;  %v1745_v27 = vpop.f32.mrb[1].mxu0 }
 0x34b   :  { %v1746_v28 = vadd.f32 %v2154_v23, %v1745_v27  ;;  %v2386_v31 = vpop.f32.mrb[2].mxu0 }
 0x34c   :  { %1778 = vst [vmem:[%s3495_s13 + $0x10] sm:$0xff] %v1754_v25  ;;  %v1757_v33 = vadd.f32 %v2386_v31, %v2154_v23  ;;  %v1748_v53 = vpop.f32.mrb[3].mxu0 }
 0x34d   :  { %1776 = vst [vmem:[%s3495_s13] sm:$0xff] %v1746_v28  ;;  %v1749_v36 = vadd.f32 %v2154_v23, %v1748_v53 }
 0x34e   :  { %1779 = vst [vmem:[%s3495_s13 + $0x18] sm:$0xff] %v1757_v33 }
 0x34f   :  { %1777 = vst [vmem:[%s3495_s13 + $0x8] sm:$0xff] %v1749_v36 }
 0x351   :  { %v2389_v38 = vpop.f32.mrb[4].mxu0 }
 0x352   :  { %v1770_v34 = vadd.f32 %v2389_v38, %v2154_v23  ;;  %v1761_v44 = vpop.f32.mrb[5].mxu0 }
 0x353   :  { %v1762_v45 = vadd.f32 %v2154_v23, %v1761_v44  ;;  %v2390_v50 = vpop.f32.mrb[6].mxu0 }
 0x354   :  { %1782 = vst [vmem:[%s3495_s13 + $0x30] sm:$0xff] %v1770_v34  ;;  %v1773_v39 = vadd.f32 %v2390_v50, %v2154_v23  ;;  %v1764_v5 = vpop.f32.mrb[7].mxu0 }
 0x355   :  { %1780 = vst [vmem:[%s3495_s13 + $0x20] sm:$0xff] %v1762_v45  ;;  %v1765_v3 = vadd.f32 %v2154_v23, %v1764_v5 }
 0x356   :  { %1783 = vst [vmem:[%s3495_s13 + $0x38] sm:$0xff] %v1773_v39 }
 0x357   :  { %1781 = vst [vmem:[%s3495_s13 + $0x28] sm:$0xff] %v1765_v3 }
 0x359   :  { %v2409_v26 = vpop.f32.mrb[0].mxu1 }
 0x35a   :  { %1947 = vst [vmem:[%s3496_s14 + $0x10] sm:$0xff] %v2409_v26  ;;  %v1914_v29 = vpop.f32.mrb[1].mxu1 }
 0x35b   :  { %1945 = vst [vmem:[%s3496_s14] sm:$0xff] %v1914_v29  ;;  %v2410_v35 = vpop.f32.mrb[2].mxu1 }
 0x35c   :  { %1948 = vst [vmem:[%s3496_s14 + $0x18] sm:$0xff] %v2410_v35  ;;  %v1917_v41 = vpop.f32.mrb[3].mxu1 }
 0x35d   :  { %1946 = vst [vmem:[%s3496_s14 + $0x8] sm:$0xff] %v1917_v41 }
 0x361   :  { %v2413_v32 = vpop.f32.mrb[4].mxu1 }
 0x362   :  { %1951 = vst [vmem:[%s3496_s14 + $0x30] sm:$0xff] %v2413_v32  ;;  %v1930_v43 = vpop.f32.mrb[5].mxu1 }
 0x363   :  { %1949 = vst [vmem:[%s3496_s14 + $0x20] sm:$0xff] %v1930_v43  ;;  %v2414_v55 = vpop.f32.mrb[6].mxu1 }
 0x364   :  { %1952 = vst [vmem:[%s3496_s14 + $0x38] sm:$0xff] %v2414_v55  ;;  %v1933_v49 = vpop.f32.mrb[7].mxu1 }
 0x365   :  { %1950 = vst [vmem:[%s3496_s14 + $0x28] sm:$0xff] %v1933_v49 }

</bundles_post_ra>
